<compile_context>
chip_gen: v7x
topology: tpu7x:2x2x1
jax: 0.10.0
libtpu: 0.0.40
codegen_flags: <defaults>
</compile_context>

<pallas_src>
import math

import jax
import jax.numpy as jnp
from jax.experimental import pallas as pl
from jax.experimental.pallas import tpu as pltpu

# ----- small synthetic ViT config (deterministic, no checkpoint) -----
PATCH = 16            # patch size (like vit_base_patch16)
IMG   = 32            # image spatial size -> 2x2 = 4 patches
C_IN  = 3             # RGB
EMBED = 32            # embed_dim (small stand-in for 768)
HEADS = 4             # attention heads
DEPTH = 2             # transformer blocks (small stand-in for 12)
MLP   = 4 * EMBED     # MLP hidden dim (mlp_ratio = 4)
EPS   = 1e-6          # timm ViT LayerNorm eps

NPATCH   = (IMG // PATCH) ** 2        # 4 patches
SEQ      = NPATCH + 1                 # 5 tokens (CLS + patches)
S_PAD    = 8                          # tokens padded to a sublane multiple (197 -> 208 for real ViT)
CPP      = C_IN * PATCH * PATCH       # 768 = flattened patch size
HEAD_DIM = EMBED // HEADS             # 8


def _erf(z):
    """Abramowitz & Stegun 7.1.26 erf approximation, |err| < 1.5e-7.
    Uses only exp / mul / add / div / where (guaranteed Mosaic lowerings)."""
    a1, a2, a3, a4, a5 = 0.254829592, -0.284496736, 1.421413741, -1.453152027, 1.061405429
    p = 0.3275911
    za = jnp.abs(z)
    t = 1.0 / (1.0 + p * za)
    poly = ((((a5 * t + a4) * t + a3) * t + a2) * t + a1) * t
    y = 1.0 - poly * jnp.exp(-za * za)
    return jnp.where(z >= 0, y, -y)


def _ln(h, g, b):
    mu = jnp.mean(h, axis=-1, keepdims=True)
    var = jnp.mean(jnp.square(h - mu), axis=-1, keepdims=True)
    return (h - mu) * jax.lax.rsqrt(var + EPS) * g + b


# ----------------- fused encoder kernel (one grid step = one image x one block) -----------------

def _encoder_kernel(patches_ref, pw_ref, base_ref,
                    ln1g_ref, ln1b_ref, wqkv_ref, bqkv_ref, wo_ref, bo_ref,
                    ln2g_ref, ln2b_ref, w1_ref, b1_ref, w2_ref, b2_ref,
                    ng_ref, nb_ref, out_ref, x_scr):
    d = pl.program_id(1)

    # ---- layer 0 only: patch embed + [CLS | patches | pad] token slab assembly ----
    # patches_ref row 0 and pad rows are zero, so one aligned matmul + one add builds
    # the whole slab (CLS + pos[0], patch_embed + patch_b + pos[1:], zero pads).
    @pl.when(d == 0)
    def _():
        tok = jnp.dot(patches_ref[0], pw_ref[...],
                      preferred_element_type=jnp.float32)          # (S_PAD, D) f32
        x_scr[...] = tok + base_ref[...]

    x = x_scr[...]                                                  # (S_PAD, D) f32

    # additive key mask for the padded token columns (built in-kernel, no DMA)
    col = jax.lax.broadcasted_iota(jnp.int32, (1, S_PAD), 1)
    key_mask = jnp.where(col < SEQ, 0.0, -1e30).astype(jnp.float32)  # (1, S_PAD)

    # ---- multi-head self-attention (pre-norm), fused QKV matmul ----
    h16 = _ln(x, ln1g_ref[0], ln1b_ref[0]).astype(jnp.bfloat16)
    qkv = (jnp.dot(h16, wqkv_ref[0], preferred_element_type=jnp.float32)
           + bqkv_ref[0]).astype(jnp.bfloat16)                      # (S_PAD, 3D)

    # TODO(synk): for real HEADS=12 replace this static loop with a batched (H,S,dh) einsum.
    heads = []
    for hd in range(HEADS):
        q = qkv[:, hd * HEAD_DIM:(hd + 1) * HEAD_DIM]               # scale folded into W_q/b_q
        k = qkv[:, EMBED + hd * HEAD_DIM:EMBED + (hd + 1) * HEAD_DIM]
        v = qkv[:, 2 * EMBED + hd * HEAD_DIM:2 * EMBED + (hd + 1) * HEAD_DIM]
        s = jax.lax.dot_general(q, k, (((1,), (1,)), ((), ())),
                                preferred_element_type=jnp.float32)  # (S_PAD, S_PAD) f32
        s = s + key_mask
        s = s - jnp.max(s, axis=-1, keepdims=True)
        p = jnp.exp(s)
        p = p * pl.reciprocal(jnp.sum(p, axis=-1, keepdims=True), approx=True)
        heads.append(jnp.dot(p.astype(jnp.bfloat16), v,
                             preferred_element_type=jnp.float32))    # (S_PAD, dh)
    o = jnp.concatenate(heads, axis=-1).astype(jnp.bfloat16)         # (S_PAD, D)
    # single lane-dense output projection over concatenated heads
    x = x + jnp.dot(o, wo_ref[0], preferred_element_type=jnp.float32) + bo_ref[0]

    # ---- MLP (pre-norm), exact-erf GELU in f32 ----
    # TODO(synk): tile the MLP hidden dim for real ViT-B sizes (v7x 64 MiB VMEM budget).
    h2 = _ln(x, ln2g_ref[0], ln2b_ref[0]).astype(jnp.bfloat16)
    m = jnp.dot(h2, w1_ref[0], preferred_element_type=jnp.float32) + b1_ref[0]
    m = 0.5 * m * (1.0 + _erf(m * (1.0 / math.sqrt(2.0))))
    x = x + jnp.dot(m.astype(jnp.bfloat16), w2_ref[0],
                    preferred_element_type=jnp.float32) + b2_ref[0]

    x_scr[...] = x                                                   # carry to next layer

    # ---- last layer: final LayerNorm on the CLS row only (LN is per-token) ----
    @pl.when(d == pl.num_programs(1) - 1)
    def _():
        out_ref[0] = _ln(x[0:1, :], ng_ref[...], nb_ref[...])


# ----------------- wrappers -----------------

def patchify(x_nchw):
    # non-overlapping PATCHxPATCH patches, flattened in (C, ph, pw) order to match
    # Conv2d(kernel=stride=PATCH) weight layout (D, C, P, P)
    B, C, H, W = x_nchw.shape
    hp, wp = H // PATCH, W // PATCH
    x = x_nchw.reshape(B, C, hp, PATCH, wp, PATCH)
    x = x.transpose(0, 2, 4, 1, 3, 5)                 # (B, hp, wp, C, P, P)
    return x.reshape(B, hp * wp, C * PATCH * PATCH)


def prepare_params(params):
    """Repack standard (timm-style) weights into the fused-kernel layout:
    fused (D, 3D) QKV with the softmax scale folded into the Q columns, per-layer weight
    stacks for layer streaming, bf16 matmul weights, and the precomputed token 'base'
    slab (CLS + pos[0] at row 0, pos + patch_bias at patch rows, zeros at pad rows)."""
    scale = 1.0 / math.sqrt(HEAD_DIM)
    bf16 = lambda a: a.astype(jnp.bfloat16)
    blocks = params['blocks']
    stack = lambda i: jnp.stack([b[i] for b in blocks], axis=0)

    def fold_w(w):   # (D, 3D): columns [q | k | v], scale folded into q
        return jnp.concatenate([w[:, :EMBED] * scale, w[:, EMBED:]], axis=1)

    def fold_b(b):   # (1, 3D)
        return jnp.concatenate([b[:, :EMBED] * scale, b[:, EMBED:]], axis=1)

    cls = params['cls'].reshape(1, EMBED)
    pos = params['pos'].reshape(SEQ, EMBED)
    base = jnp.zeros((S_PAD, EMBED), jnp.float32)
    base = base.at[0:1, :].set(cls + pos[0:1, :])
    base = base.at[1:SEQ, :].set(pos[1:SEQ, :] + params['patch_b'])

    return dict(
        patch_w=bf16(params['patch_w']),                       # (CPP, D) bf16
        base=base,                                             # (S_PAD, D) f32
        ln1g=stack(0), ln1b=stack(1),                          # (DEPTH, 1, D)
        wqkv=bf16(jnp.stack([fold_w(b[2]) for b in blocks])),  # (DEPTH, D, 3D) bf16
        bqkv=jnp.stack([fold_b(b[3]) for b in blocks]),        # (DEPTH, 1, 3D)
        wo=bf16(stack(4)), bo=stack(5),                        # (DEPTH, D, D) / (DEPTH, 1, D)
        ln2g=stack(6), ln2b=stack(7),
        w1=bf16(stack(8)), b1=stack(9),                        # (DEPTH, D, MLP) / (DEPTH, 1, MLP)
        w2=bf16(stack(10)), b2=stack(11),                      # (DEPTH, MLP, D) / (DEPTH, 1, D)
        norm_g=params['norm_g'], norm_b=params['norm_b'],      # (1, D)
    )


@jax.jit
def vision_encoder_forward(x_nchw, kp):
    B = x_nchw.shape[0]
    patches = patchify(x_nchw)                                  # (B, N, CPP) f32
    # pad to S_PAD token rows (row 0 = CLS slot, tail = pad) and cast to bf16 for DMA
    patches_pad = jnp.zeros((B, S_PAD, CPP), jnp.float32)
    patches_pad = patches_pad.at[:, 1:SEQ, :].set(patches)
    patches_pad = patches_pad.astype(jnp.bfloat16)

    batch_map = lambda b, d: (b, 0, 0)     # per-image block, resident across the layer axis
    layer_map = lambda b, d: (d, 0, 0)     # per-layer weight streaming (double-buffered)
    const2 = lambda b, d: (0, 0)

    out = pl.pallas_call(
        _encoder_kernel,
        out_shape=jax.ShapeDtypeStruct((B, 1, EMBED), jnp.float32),
        grid_spec=pltpu.PrefetchScalarGridSpec(
            num_scalar_prefetch=0,
            grid=(B, DEPTH),
            in_specs=[
                pl.BlockSpec((1, S_PAD, CPP), batch_map),          # patches_pad (bf16)
                pl.BlockSpec((CPP, EMBED), const2),                # patch_w
                pl.BlockSpec((S_PAD, EMBED), const2),              # base
                pl.BlockSpec((1, 1, EMBED), layer_map),            # ln1 gamma
                pl.BlockSpec((1, 1, EMBED), layer_map),            # ln1 beta
                pl.BlockSpec((1, EMBED, 3 * EMBED), layer_map),    # W_qkv
                pl.BlockSpec((1, 1, 3 * EMBED), layer_map),        # b_qkv
                pl.BlockSpec((1, EMBED, EMBED), layer_map),        # W_o
                pl.BlockSpec((1, 1, EMBED), layer_map),            # b_o
                pl.BlockSpec((1, 1, EMBED), layer_map),            # ln2 gamma
                pl.BlockSpec((1, 1, EMBED), layer_map),            # ln2 beta
                pl.BlockSpec((1, EMBED, MLP), layer_map),          # W_fc1
                pl.BlockSpec((1, 1, MLP), layer_map),              # b_fc1
                pl.BlockSpec((1, MLP, EMBED), layer_map),          # W_fc2
                pl.BlockSpec((1, 1, EMBED), layer_map),            # b_fc2
                pl.BlockSpec((1, EMBED), const2),                  # final norm gamma
                pl.BlockSpec((1, EMBED), const2),                  # final norm beta
            ],
            out_specs=pl.BlockSpec((1, 1, EMBED), batch_map),
            scratch_shapes=[pltpu.VMEM((S_PAD, EMBED), jnp.float32)],  # activation carry
        ),
        compiler_params=pltpu.CompilerParams(
            dimension_semantics=("parallel", "arbitrary"),
            # <= 48 MiB: safe on v7x (64 MiB physical) and generous on v5e/v6e.
            vmem_limit_bytes=48 * 1024 * 1024,
        ),
    )(patches_pad, kp['patch_w'], kp['base'],
      kp['ln1g'], kp['ln1b'], kp['wqkv'], kp['bqkv'], kp['wo'], kp['bo'],
      kp['ln2g'], kp['ln2b'], kp['w1'], kp['b1'], kp['w2'], kp['b2'],
      kp['norm_g'], kp['norm_b'])
    return out.reshape(B, EMBED)


def init_params(key):
    """Standard (timm-style) layout; converted to the kernel layout by prepare_params."""
    keys = jax.random.split(key, 3 + DEPTH)

    def nrm(k, shp, scale=0.02):
        return (scale * jax.random.normal(k, shp)).astype(jnp.float32)

    params = {
        'patch_w': nrm(keys[0], (CPP, EMBED)),
        'patch_b': jnp.zeros((1, EMBED), jnp.float32),
        'cls':     nrm(keys[1], (1, 1, EMBED)),
        'pos':     nrm(keys[2], (1, SEQ, EMBED)),
        'norm_g':  jnp.ones((1, EMBED), jnp.float32),
        'norm_b':  jnp.zeros((1, EMBED), jnp.float32),
    }
    blocks = []
    for d in range(DEPTH):
        bk = jax.random.split(keys[3 + d], 4)
        blocks.append((
            jnp.ones((1, EMBED), jnp.float32), jnp.zeros((1, EMBED), jnp.float32),      # ln1
            nrm(bk[0], (EMBED, 3 * EMBED)),    jnp.zeros((1, 3 * EMBED), jnp.float32),  # qkv
            nrm(bk[1], (EMBED, EMBED)),        jnp.zeros((1, EMBED), jnp.float32),      # proj
            jnp.ones((1, EMBED), jnp.float32), jnp.zeros((1, EMBED), jnp.float32),      # ln2
            nrm(bk[2], (EMBED, MLP)),          jnp.zeros((1, MLP), jnp.float32),        # fc1
            nrm(bk[3], (MLP, EMBED)),          jnp.zeros((1, EMBED), jnp.float32),      # fc2
        ))
    params['blocks'] = blocks
    return params


def reference_forward(x_nchw, params):
    """Pure-JAX f32 reference (mirrors timm ViT forward_features + CLS slice)."""
    B = x_nchw.shape[0]
    scale = 1.0 / math.sqrt(HEAD_DIM)
    patches = patchify(x_nchw)
    tok = patches @ params['patch_w'] + params['patch_b']
    cls = jnp.broadcast_to(params['cls'], (B, 1, EMBED))
    x = jnp.concatenate([cls, tok], axis=1) + params['pos']

    def ln(h, g, b):
        mu = h.mean(-1, keepdims=True)
        var = ((h - mu) ** 2).mean(-1, keepdims=True)
        return (h - mu) / jnp.sqrt(var + EPS) * g + b

    for (l1g, l1b, wqkv, bqkv, wo, bo, l2g, l2b, w1, b1, w2, b2) in params['blocks']:
        h = ln(x, l1g, l1b)
        qkv = h @ wqkv + bqkv
        q = qkv[..., :EMBED].reshape(B, SEQ, HEADS, HEAD_DIM).transpose(0, 2, 1, 3) * scale
        k = qkv[..., EMBED:2 * EMBED].reshape(B, SEQ, HEADS, HEAD_DIM).transpose(0, 2, 1, 3)
        v = qkv[..., 2 * EMBED:].reshape(B, SEQ, HEADS, HEAD_DIM).transpose(0, 2, 1, 3)
        p = jax.nn.softmax(q @ k.transpose(0, 1, 3, 2), axis=-1)
        o = (p @ v).transpose(0, 2, 1, 3).reshape(B, SEQ, EMBED)
        x = x + o @ wo + bo
        h2 = ln(x, l2g, l2b)
        m = h2 @ w1 + b1
        m = 0.5 * m * (1.0 + jax.scipy.special.erf(m / jnp.sqrt(2.0)))
        x = x + m @ w2 + b2
    x = ln(x, params['norm_g'], params['norm_b'])
    return x[:, 0, :]


if __name__ == "__main__":
    key = jax.random.PRNGKey(0)
    kx, kp_key = jax.random.split(key)
    x = jax.random.normal(kx, (2, C_IN, IMG, IMG), dtype=jnp.float32)
    params = init_params(kp_key)
    kparams = prepare_params(params)

    out = vision_encoder_forward(x, kparams)
    jax.block_until_ready(out)
    assert out.shape == (2, EMBED) and out.dtype == jnp.float32
    assert bool(jnp.all(jnp.isfinite(out))), "non-finite output"

    ref = reference_forward(x, params)
    err = float(jnp.max(jnp.abs(out - ref)))
    assert err < 1e-1, f"max abs error vs f32 reference too large: {err}"
    print("KERNEL_OK")
</pallas_src>

<mosaic_0001>
module attributes {stable_mosaic.version = 11 : i64} {
  func.func @_encoder_kernel(%arg0: i32, %arg1: i32, %arg2: memref<1x8x768xbf16, #tpu.memory_space<vmem>>, %arg3: memref<768x32xbf16, #tpu.memory_space<vmem>>, %arg4: memref<8x32xf32, #tpu.memory_space<vmem>>, %arg5: memref<1x1x32xf32, #tpu.memory_space<vmem>>, %arg6: memref<1x1x32xf32, #tpu.memory_space<vmem>>, %arg7: memref<1x32x96xbf16, #tpu.memory_space<vmem>>, %arg8: memref<1x1x96xf32, #tpu.memory_space<vmem>>, %arg9: memref<1x32x32xbf16, #tpu.memory_space<vmem>>, %arg10: memref<1x1x32xf32, #tpu.memory_space<vmem>>, %arg11: memref<1x1x32xf32, #tpu.memory_space<vmem>>, %arg12: memref<1x1x32xf32, #tpu.memory_space<vmem>>, %arg13: memref<1x32x128xbf16, #tpu.memory_space<vmem>>, %arg14: memref<1x1x128xf32, #tpu.memory_space<vmem>>, %arg15: memref<1x128x32xbf16, #tpu.memory_space<vmem>>, %arg16: memref<1x1x32xf32, #tpu.memory_space<vmem>>, %arg17: memref<1x32xf32, #tpu.memory_space<vmem>>, %arg18: memref<1x32xf32, #tpu.memory_space<vmem>>, %arg19: memref<1x1x32xf32, #tpu.memory_space<vmem>>, %arg20: memref<8x32xf32, #tpu.memory_space<vmem>>) attributes {dimension_semantics = [#tpu.dimension_semantics<parallel>, #tpu.dimension_semantics<arbitrary>], iteration_bounds = array<i64: 2, 2>, scalar_prefetch = 0 : i64, scratch_operands = 1 : i64, tpu.core_type = #tpu.core_type<tc>, window_params = [{transform_indices = @transform_0, window_bounds = array<i64: 1, 8, 768>}, {pipeline_mode = #tpu.pipeline_mode<synchronous>, transform_indices = @transform_1, window_bounds = array<i64: 768, 32>}, {pipeline_mode = #tpu.pipeline_mode<synchronous>, transform_indices = @transform_2, window_bounds = array<i64: 8, 32>}, {transform_indices = @transform_3, window_bounds = array<i64: 1, 1, 32>}, {transform_indices = @transform_4, window_bounds = array<i64: 1, 1, 32>}, {transform_indices = @transform_5, window_bounds = array<i64: 1, 32, 96>}, {transform_indices = @transform_6, window_bounds = array<i64: 1, 1, 96>}, {transform_indices = @transform_7, window_bounds = array<i64: 1, 32, 32>}, {transform_indices = @transform_8, window_bounds = array<i64: 1, 1, 32>}, {transform_indices = @transform_9, window_bounds = array<i64: 1, 1, 32>}, {transform_indices = @transform_10, window_bounds = array<i64: 1, 1, 32>}, {transform_indices = @transform_11, window_bounds = array<i64: 1, 32, 128>}, {transform_indices = @transform_12, window_bounds = array<i64: 1, 1, 128>}, {transform_indices = @transform_13, window_bounds = array<i64: 1, 128, 32>}, {transform_indices = @transform_14, window_bounds = array<i64: 1, 1, 32>}, {pipeline_mode = #tpu.pipeline_mode<synchronous>, transform_indices = @transform_15, window_bounds = array<i64: 1, 32>}, {pipeline_mode = #tpu.pipeline_mode<synchronous>, transform_indices = @transform_16, window_bounds = array<i64: 1, 32>}, {transform_indices = @transform_17, window_bounds = array<i64: 1, 1, 32>}]} {
    %c0_i32 = arith.constant 0 : i32
    %0 = arith.cmpi eq, %arg1, %c0_i32 : i32
    %1 = arith.extui %0 : i1 to i32
    %c0_i32_0 = arith.constant 0 : i32
    %2 = arith.cmpi ne, %1, %c0_i32_0 : i32
    scf.if %2 {
      %c0_87 = arith.constant 0 : index
      %c0_88 = arith.constant 0 : index
      %c0_89 = arith.constant 0 : index
      %214 = vector.load %arg2[%c0_87, %c0_88, %c0_89] : memref<1x8x768xbf16, #tpu.memory_space<vmem>>, vector<1x8x768xbf16>
      %215 = vector.shape_cast %214 : vector<1x8x768xbf16> to vector<8x768xbf16>
      %c0_90 = arith.constant 0 : index
      %c0_91 = arith.constant 0 : index
      %216 = vector.load %arg3[%c0_90, %c0_91] : memref<768x32xbf16, #tpu.memory_space<vmem>>, vector<768x32xbf16>
      %cst_92 = arith.constant dense<0.000000e+00> : vector<8x32xf32>
      %217 = tpu.matmul %215, %216, %cst_92 {dimension_numbers = #tpu.dot_dimension_numbers<[1], [0], [0], [1], [0, 0, 1, 1], [], []>} : vector<8x768xbf16>, vector<768x32xbf16>, vector<8x32xf32> -> vector<8x32xf32>
      %c0_93 = arith.constant 0 : index
      %c0_94 = arith.constant 0 : index
      %218 = vector.load %arg4[%c0_93, %c0_94] : memref<8x32xf32, #tpu.memory_space<vmem>>, vector<8x32xf32>
      %219 = arith.addf %217, %218 : vector<8x32xf32>
      %c0_95 = arith.constant 0 : index
      %c0_96 = arith.constant 0 : index
      %220 = vector.load %arg20[%c0_95, %c0_96] : memref<8x32xf32, #tpu.memory_space<vmem>>, vector<8x32xf32>
      tpu.vector_store %arg20[%c0_95, %c0_96], %219 {strides = array<i32>} : memref<8x32xf32, #tpu.memory_space<vmem>>, vector<8x32xf32>,
    } else {
    }
    %c0 = arith.constant 0 : index
    %c0_1 = arith.constant 0 : index
    %3 = vector.load %arg20[%c0, %c0_1] : memref<8x32xf32, #tpu.memory_space<vmem>>, vector<8x32xf32>
    %4 = tpu.iota {dimensions = array<i32: 1>} : vector<1x8xi32>
    %c5_i32 = arith.constant 5 : i32
    %5 = vector.broadcast %c5_i32 : i32 to vector<1x8xi32>
    %6 = arith.cmpi slt, %4, %5 : vector<1x8xi32>
    %cst = arith.constant 0.000000e+00 : f32
    %cst_2 = arith.constant -1.000000e+30 : f32
    %7 = vector.broadcast %cst : f32 to vector<1x8xf32>
    %8 = vector.broadcast %cst_2 : f32 to vector<1x8xf32>
    %9 = arith.select %6, %7, %8 : vector<1x8xi1>, vector<1x8xf32>
    %c0_3 = arith.constant 0 : index
    %c0_4 = arith.constant 0 : index
    %c0_5 = arith.constant 0 : index
    %10 = vector.load %arg5[%c0_3, %c0_4, %c0_5] : memref<1x1x32xf32, #tpu.memory_space<vmem>>, vector<1x1x32xf32>
    %11 = vector.shape_cast %10 : vector<1x1x32xf32> to vector<1x32xf32>
    %c0_6 = arith.constant 0 : index
    %c0_7 = arith.constant 0 : index
    %c0_8 = arith.constant 0 : index
    %12 = vector.load %arg6[%c0_6, %c0_7, %c0_8] : memref<1x1x32xf32, #tpu.memory_space<vmem>>, vector<1x1x32xf32>
    %13 = vector.shape_cast %12 : vector<1x1x32xf32> to vector<1x32xf32>
    %cst_9 = arith.constant dense<0.000000e+00> : vector<8xf32>
    %14 = vector.multi_reduction <add>, %3, %cst_9 [1] : vector<8x32xf32> to vector<8xf32>
    %15 = vector.shape_cast %14 : vector<8xf32> to vector<8x1xf32>
    %cst_10 = arith.constant 3.200000e+01 : f32
    %16 = vector.broadcast %cst_10 : f32 to vector<8x1xf32>
    %17 = arith.divf %15, %16 : vector<8x1xf32>
    %18 = vector.broadcast %17 : vector<8x1xf32> to vector<8x32xf32>
    %19 = arith.subf %3, %18 : vector<8x32xf32>
    %20 = arith.mulf %19, %19 : vector<8x32xf32>
    %cst_11 = arith.constant dense<0.000000e+00> : vector<8xf32>
    %21 = vector.multi_reduction <add>, %20, %cst_11 [1] : vector<8x32xf32> to vector<8xf32>
    %22 = vector.shape_cast %21 : vector<8xf32> to vector<8x1xf32>
    %cst_12 = arith.constant 3.200000e+01 : f32
    %23 = vector.broadcast %cst_12 : f32 to vector<8x1xf32>
    %24 = arith.divf %22, %23 : vector<8x1xf32>
    %25 = vector.broadcast %17 : vector<8x1xf32> to vector<8x32xf32>
    %26 = arith.subf %3, %25 : vector<8x32xf32>
    %cst_13 = arith.constant 9.99999997E-7 : f32
    %27 = vector.broadcast %cst_13 : f32 to vector<8x1xf32>
    %28 = arith.addf %24, %27 : vector<8x1xf32>
    %29 = math.rsqrt %28 : vector<8x1xf32>
    %30 = vector.broadcast %29 : vector<8x1xf32> to vector<8x32xf32>
    %31 = arith.mulf %26, %30 : vector<8x32xf32>
    %32 = vector.broadcast %11 : vector<1x32xf32> to vector<8x32xf32>
    %33 = arith.mulf %31, %32 : vector<8x32xf32>
    %34 = vector.broadcast %13 : vector<1x32xf32> to vector<8x32xf32>
    %35 = arith.addf %33, %34 : vector<8x32xf32>
    %36 = arith.truncf %35 : vector<8x32xf32> to vector<8x32xbf16>
    %c0_14 = arith.constant 0 : index
    %c0_15 = arith.constant 0 : index
    %c0_16 = arith.constant 0 : index
    %37 = vector.load %arg7[%c0_14, %c0_15, %c0_16] : memref<1x32x96xbf16, #tpu.memory_space<vmem>>, vector<1x32x96xbf16>
    %38 = vector.shape_cast %37 : vector<1x32x96xbf16> to vector<32x96xbf16>
    %cst_17 = arith.constant dense<0.000000e+00> : vector<8x96xf32>
    %39 = tpu.matmul %36, %38, %cst_17 {dimension_numbers = #tpu.dot_dimension_numbers<[1], [0], [0], [1], [0, 0, 1, 1], [], []>} : vector<8x32xbf16>, vector<32x96xbf16>, vector<8x96xf32> -> vector<8x96xf32>
    %c0_18 = arith.constant 0 : index
    %c0_19 = arith.constant 0 : index
    %c0_20 = arith.constant 0 : index
    %40 = vector.load %arg8[%c0_18, %c0_19, %c0_20] : memref<1x1x96xf32, #tpu.memory_space<vmem>>, vector<1x1x96xf32>
    %41 = vector.shape_cast %40 : vector<1x1x96xf32> to vector<1x96xf32>
    %42 = vector.broadcast %41 : vector<1x96xf32> to vector<8x96xf32>
    %43 = arith.addf %39, %42 : vector<8x96xf32>
    %44 = arith.truncf %43 : vector<8x96xf32> to vector<8x96xbf16>
    %45 = vector.extract_strided_slice %44 {offsets = [0, 0], sizes = [8, 8], strides = [1, 1]} : vector<8x96xbf16> to vector<8x8xbf16>
    %46 = vector.extract_strided_slice %44 {offsets = [0, 32], sizes = [8, 8], strides = [1, 1]} : vector<8x96xbf16> to vector<8x8xbf16>
    %47 = vector.extract_strided_slice %44 {offsets = [0, 64], sizes = [8, 8], strides = [1, 1]} : vector<8x96xbf16> to vector<8x8xbf16>
    %cst_21 = arith.constant dense<0.000000e+00> : vector<8x8xf32>
    %48 = tpu.matmul %45, %46, %cst_21 {dimension_numbers = #tpu.dot_dimension_numbers<[1], [1], [0], [0], [0, 0, 1, 0], [], []>} : vector<8x8xbf16>, vector<8x8xbf16>, vector<8x8xf32> -> vector<8x8xf32>
    %49 = vector.broadcast %9 : vector<1x8xf32> to vector<8x8xf32>
    %50 = arith.addf %48, %49 : vector<8x8xf32>
    %cst_22 = arith.constant dense<0xFF800000> : vector<8xf32>
    %51 = vector.multi_reduction <maximumf>, %50, %cst_22 [1] : vector<8x8xf32> to vector<8xf32>
    %52 = vector.shape_cast %51 : vector<8xf32> to vector<8x1xf32>
    %53 = vector.broadcast %52 : vector<8x1xf32> to vector<8x8xf32>
    %54 = arith.subf %50, %53 : vector<8x8xf32>
    %55 = math.exp %54 : vector<8x8xf32>
    %cst_23 = arith.constant dense<0.000000e+00> : vector<8xf32>
    %56 = vector.multi_reduction <add>, %55, %cst_23 [1] : vector<8x8xf32> to vector<8xf32>
    %57 = vector.shape_cast %56 : vector<8xf32> to vector<8x1xf32>
    %58 = tpu.reciprocal %57 {approx = true} : vector<8x1xf32> -> vector<8x1xf32>
    %59 = vector.broadcast %58 : vector<8x1xf32> to vector<8x8xf32>
    %60 = arith.mulf %55, %59 : vector<8x8xf32>
    %61 = arith.truncf %60 : vector<8x8xf32> to vector<8x8xbf16>
    %cst_24 = arith.constant dense<0.000000e+00> : vector<8x8xf32>
    %62 = tpu.matmul %61, %47, %cst_24 {dimension_numbers = #tpu.dot_dimension_numbers<[1], [0], [0], [1], [0, 0, 1, 1], [], []>} : vector<8x8xbf16>, vector<8x8xbf16>, vector<8x8xf32> -> vector<8x8xf32>
    %63 = vector.extract_strided_slice %44 {offsets = [0, 8], sizes = [8, 8], strides = [1, 1]} : vector<8x96xbf16> to vector<8x8xbf16>
    %64 = vector.extract_strided_slice %44 {offsets = [0, 40], sizes = [8, 8], strides = [1, 1]} : vector<8x96xbf16> to vector<8x8xbf16>
    %65 = vector.extract_strided_slice %44 {offsets = [0, 72], sizes = [8, 8], strides = [1, 1]} : vector<8x96xbf16> to vector<8x8xbf16>
    %cst_25 = arith.constant dense<0.000000e+00> : vector<8x8xf32>
    %66 = tpu.matmul %63, %64, %cst_25 {dimension_numbers = #tpu.dot_dimension_numbers<[1], [1], [0], [0], [0, 0, 1, 0], [], []>} : vector<8x8xbf16>, vector<8x8xbf16>, vector<8x8xf32> -> vector<8x8xf32>
    %67 = vector.broadcast %9 : vector<1x8xf32> to vector<8x8xf32>
    %68 = arith.addf %66, %67 : vector<8x8xf32>
    %cst_26 = arith.constant dense<0xFF800000> : vector<8xf32>
    %69 = vector.multi_reduction <maximumf>, %68, %cst_26 [1] : vector<8x8xf32> to vector<8xf32>
    %70 = vector.shape_cast %69 : vector<8xf32> to vector<8x1xf32>
    %71 = vector.broadcast %70 : vector<8x1xf32> to vector<8x8xf32>
    %72 = arith.subf %68, %71 : vector<8x8xf32>
    %73 = math.exp %72 : vector<8x8xf32>
    %cst_27 = arith.constant dense<0.000000e+00> : vector<8xf32>
    %74 = vector.multi_reduction <add>, %73, %cst_27 [1] : vector<8x8xf32> to vector<8xf32>
    %75 = vector.shape_cast %74 : vector<8xf32> to vector<8x1xf32>
    %76 = tpu.reciprocal %75 {approx = true} : vector<8x1xf32> -> vector<8x1xf32>
    %77 = vector.broadcast %76 : vector<8x1xf32> to vector<8x8xf32>
    %78 = arith.mulf %73, %77 : vector<8x8xf32>
    %79 = arith.truncf %78 : vector<8x8xf32> to vector<8x8xbf16>
    %cst_28 = arith.constant dense<0.000000e+00> : vector<8x8xf32>
    %80 = tpu.matmul %79, %65, %cst_28 {dimension_numbers = #tpu.dot_dimension_numbers<[1], [0], [0], [1], [0, 0, 1, 1], [], []>} : vector<8x8xbf16>, vector<8x8xbf16>, vector<8x8xf32> -> vector<8x8xf32>
    %81 = vector.extract_strided_slice %44 {offsets = [0, 16], sizes = [8, 8], strides = [1, 1]} : vector<8x96xbf16> to vector<8x8xbf16>
    %82 = vector.extract_strided_slice %44 {offsets = [0, 48], sizes = [8, 8], strides = [1, 1]} : vector<8x96xbf16> to vector<8x8xbf16>
    %83 = vector.extract_strided_slice %44 {offsets = [0, 80], sizes = [8, 8], strides = [1, 1]} : vector<8x96xbf16> to vector<8x8xbf16>
    %cst_29 = arith.constant dense<0.000000e+00> : vector<8x8xf32>
    %84 = tpu.matmul %81, %82, %cst_29 {dimension_numbers = #tpu.dot_dimension_numbers<[1], [1], [0], [0], [0, 0, 1, 0], [], []>} : vector<8x8xbf16>, vector<8x8xbf16>, vector<8x8xf32> -> vector<8x8xf32>
    %85 = vector.broadcast %9 : vector<1x8xf32> to vector<8x8xf32>
    %86 = arith.addf %84, %85 : vector<8x8xf32>
    %cst_30 = arith.constant dense<0xFF800000> : vector<8xf32>
    %87 = vector.multi_reduction <maximumf>, %86, %cst_30 [1] : vector<8x8xf32> to vector<8xf32>
    %88 = vector.shape_cast %87 : vector<8xf32> to vector<8x1xf32>
    %89 = vector.broadcast %88 : vector<8x1xf32> to vector<8x8xf32>
    %90 = arith.subf %86, %89 : vector<8x8xf32>
    %91 = math.exp %90 : vector<8x8xf32>
    %cst_31 = arith.constant dense<0.000000e+00> : vector<8xf32>
    %92 = vector.multi_reduction <add>, %91, %cst_31 [1] : vector<8x8xf32> to vector<8xf32>
    %93 = vector.shape_cast %92 : vector<8xf32> to vector<8x1xf32>
    %94 = tpu.reciprocal %93 {approx = true} : vector<8x1xf32> -> vector<8x1xf32>
    %95 = vector.broadcast %94 : vector<8x1xf32> to vector<8x8xf32>
    %96 = arith.mulf %91, %95 : vector<8x8xf32>
    %97 = arith.truncf %96 : vector<8x8xf32> to vector<8x8xbf16>
    %cst_32 = arith.constant dense<0.000000e+00> : vector<8x8xf32>
    %98 = tpu.matmul %97, %83, %cst_32 {dimension_numbers = #tpu.dot_dimension_numbers<[1], [0], [0], [1], [0, 0, 1, 1], [], []>} : vector<8x8xbf16>, vector<8x8xbf16>, vector<8x8xf32> -> vector<8x8xf32>
    %99 = vector.extract_strided_slice %44 {offsets = [0, 24], sizes = [8, 8], strides = [1, 1]} : vector<8x96xbf16> to vector<8x8xbf16>
    %100 = vector.extract_strided_slice %44 {offsets = [0, 56], sizes = [8, 8], strides = [1, 1]} : vector<8x96xbf16> to vector<8x8xbf16>
    %101 = vector.extract_strided_slice %44 {offsets = [0, 88], sizes = [8, 8], strides = [1, 1]} : vector<8x96xbf16> to vector<8x8xbf16>
    %cst_33 = arith.constant dense<0.000000e+00> : vector<8x8xf32>
    %102 = tpu.matmul %99, %100, %cst_33 {dimension_numbers = #tpu.dot_dimension_numbers<[1], [1], [0], [0], [0, 0, 1, 0], [], []>} : vector<8x8xbf16>, vector<8x8xbf16>, vector<8x8xf32> -> vector<8x8xf32>
    %103 = vector.broadcast %9 : vector<1x8xf32> to vector<8x8xf32>
    %104 = arith.addf %102, %103 : vector<8x8xf32>
    %cst_34 = arith.constant dense<0xFF800000> : vector<8xf32>
    %105 = vector.multi_reduction <maximumf>, %104, %cst_34 [1] : vector<8x8xf32> to vector<8xf32>
    %106 = vector.shape_cast %105 : vector<8xf32> to vector<8x1xf32>
    %107 = vector.broadcast %106 : vector<8x1xf32> to vector<8x8xf32>
    %108 = arith.subf %104, %107 : vector<8x8xf32>
    %109 = math.exp %108 : vector<8x8xf32>
    %cst_35 = arith.constant dense<0.000000e+00> : vector<8xf32>
    %110 = vector.multi_reduction <add>, %109, %cst_35 [1] : vector<8x8xf32> to vector<8xf32>
    %111 = vector.shape_cast %110 : vector<8xf32> to vector<8x1xf32>
    %112 = tpu.reciprocal %111 {approx = true} : vector<8x1xf32> -> vector<8x1xf32>
    %113 = vector.broadcast %112 : vector<8x1xf32> to vector<8x8xf32>
    %114 = arith.mulf %109, %113 : vector<8x8xf32>
    %115 = arith.truncf %114 : vector<8x8xf32> to vector<8x8xbf16>
    %cst_36 = arith.constant dense<0.000000e+00> : vector<8x8xf32>
    %116 = tpu.matmul %115, %101, %cst_36 {dimension_numbers = #tpu.dot_dimension_numbers<[1], [0], [0], [1], [0, 0, 1, 1], [], []>} : vector<8x8xbf16>, vector<8x8xbf16>, vector<8x8xf32> -> vector<8x8xf32>
    %117 = tpu.concatenate %62, %80, %98, %116 in 1 : vector<8x8xf32>, vector<8x8xf32>, vector<8x8xf32>, vector<8x8xf32> -> vector<8x32xf32>
    %118 = arith.truncf %117 : vector<8x32xf32> to vector<8x32xbf16>
    %c0_37 = arith.constant 0 : index
    %c0_38 = arith.constant 0 : index
    %c0_39 = arith.constant 0 : index
    %119 = vector.load %arg9[%c0_37, %c0_38, %c0_39] : memref<1x32x32xbf16, #tpu.memory_space<vmem>>, vector<1x32x32xbf16>
    %120 = vector.shape_cast %119 : vector<1x32x32xbf16> to vector<32x32xbf16>
    %cst_40 = arith.constant dense<0.000000e+00> : vector<8x32xf32>
    %121 = tpu.matmul %118, %120, %cst_40 {dimension_numbers = #tpu.dot_dimension_numbers<[1], [0], [0], [1], [0, 0, 1, 1], [], []>} : vector<8x32xbf16>, vector<32x32xbf16>, vector<8x32xf32> -> vector<8x32xf32>
    %122 = arith.addf %3, %121 : vector<8x32xf32>
    %c0_41 = arith.constant 0 : index
    %c0_42 = arith.constant 0 : index
    %c0_43 = arith.constant 0 : index
    %123 = vector.load %arg10[%c0_41, %c0_42, %c0_43] : memref<1x1x32xf32, #tpu.memory_space<vmem>>, vector<1x1x32xf32>
    %124 = vector.shape_cast %123 : vector<1x1x32xf32> to vector<1x32xf32>
    %125 = vector.broadcast %124 : vector<1x32xf32> to vector<8x32xf32>
    %126 = arith.addf %122, %125 : vector<8x32xf32>
    %c0_44 = arith.constant 0 : index
    %c0_45 = arith.constant 0 : index
    %c0_46 = arith.constant 0 : index
    %127 = vector.load %arg11[%c0_44, %c0_45, %c0_46] : memref<1x1x32xf32, #tpu.memory_space<vmem>>, vector<1x1x32xf32>
    %128 = vector.shape_cast %127 : vector<1x1x32xf32> to vector<1x32xf32>
    %c0_47 = arith.constant 0 : index
    %c0_48 = arith.constant 0 : index
    %c0_49 = arith.constant 0 : index
    %129 = vector.load %arg12[%c0_47, %c0_48, %c0_49] : memref<1x1x32xf32, #tpu.memory_space<vmem>>, vector<1x1x32xf32>
    %130 = vector.shape_cast %129 : vector<1x1x32xf32> to vector<1x32xf32>
    %cst_50 = arith.constant dense<0.000000e+00> : vector<8xf32>
    %131 = vector.multi_reduction <add>, %126, %cst_50 [1] : vector<8x32xf32> to vector<8xf32>
    %132 = vector.shape_cast %131 : vector<8xf32> to vector<8x1xf32>
    %cst_51 = arith.constant 3.200000e+01 : f32
    %133 = vector.broadcast %cst_51 : f32 to vector<8x1xf32>
    %134 = arith.divf %132, %133 : vector<8x1xf32>
    %135 = vector.broadcast %134 : vector<8x1xf32> to vector<8x32xf32>
    %136 = arith.subf %126, %135 : vector<8x32xf32>
    %137 = arith.mulf %136, %136 : vector<8x32xf32>
    %cst_52 = arith.constant dense<0.000000e+00> : vector<8xf32>
    %138 = vector.multi_reduction <add>, %137, %cst_52 [1] : vector<8x32xf32> to vector<8xf32>
    %139 = vector.shape_cast %138 : vector<8xf32> to vector<8x1xf32>
    %cst_53 = arith.constant 3.200000e+01 : f32
    %140 = vector.broadcast %cst_53 : f32 to vector<8x1xf32>
    %141 = arith.divf %139, %140 : vector<8x1xf32>
    %142 = vector.broadcast %134 : vector<8x1xf32> to vector<8x32xf32>
    %143 = arith.subf %126, %142 : vector<8x32xf32>
    %cst_54 = arith.constant 9.99999997E-7 : f32
    %144 = vector.broadcast %cst_54 : f32 to vector<8x1xf32>
    %145 = arith.addf %141, %144 : vector<8x1xf32>
    %146 = math.rsqrt %145 : vector<8x1xf32>
    %147 = vector.broadcast %146 : vector<8x1xf32> to vector<8x32xf32>
    %148 = arith.mulf %143, %147 : vector<8x32xf32>
    %149 = vector.broadcast %128 : vector<1x32xf32> to vector<8x32xf32>
    %150 = arith.mulf %148, %149 : vector<8x32xf32>
    %151 = vector.broadcast %130 : vector<1x32xf32> to vector<8x32xf32>
    %152 = arith.addf %150, %151 : vector<8x32xf32>
    %153 = arith.truncf %152 : vector<8x32xf32> to vector<8x32xbf16>
    %c0_55 = arith.constant 0 : index
    %c0_56 = arith.constant 0 : index
    %c0_57 = arith.constant 0 : index
    %154 = vector.load %arg13[%c0_55, %c0_56, %c0_57] : memref<1x32x128xbf16, #tpu.memory_space<vmem>>, vector<1x32x128xbf16>
    %155 = vector.shape_cast %154 : vector<1x32x128xbf16> to vector<32x128xbf16>
    %cst_58 = arith.constant dense<0.000000e+00> : vector<8x128xf32>
    %156 = tpu.matmul %153, %155, %cst_58 {dimension_numbers = #tpu.dot_dimension_numbers<[1], [0], [0], [1], [0, 0, 1, 1], [], []>} : vector<8x32xbf16>, vector<32x128xbf16>, vector<8x128xf32> -> vector<8x128xf32>
    %c0_59 = arith.constant 0 : index
    %c0_60 = arith.constant 0 : index
    %c0_61 = arith.constant 0 : index
    %157 = vector.load %arg14[%c0_59, %c0_60, %c0_61] : memref<1x1x128xf32, #tpu.memory_space<vmem>>, vector<1x1x128xf32>
    %158 = vector.shape_cast %157 : vector<1x1x128xf32> to vector<1x128xf32>
    %159 = vector.broadcast %158 : vector<1x128xf32> to vector<8x128xf32>
    %160 = arith.addf %156, %159 : vector<8x128xf32>
    %cst_62 = arith.constant 5.000000e-01 : f32
    %161 = vector.broadcast %cst_62 : f32 to vector<8x128xf32>
    %162 = arith.mulf %161, %160 : vector<8x128xf32>
    %cst_63 = arith.constant 0.707106769 : f32
    %163 = vector.broadcast %cst_63 : f32 to vector<8x128xf32>
    %164 = arith.mulf %160, %163 : vector<8x128xf32>
    %165 = math.absf %164 : vector<8x128xf32>
    %cst_64 = arith.constant 0.327591091 : f32
    %166 = vector.broadcast %cst_64 : f32 to vector<8x128xf32>
    %167 = arith.mulf %166, %165 : vector<8x128xf32>
    %cst_65 = arith.constant 1.000000e+00 : f32
    %168 = vector.broadcast %cst_65 : f32 to vector<8x128xf32>
    %169 = arith.addf %168, %167 : vector<8x128xf32>
    %cst_66 = arith.constant 1.000000e+00 : f32
    %170 = vector.broadcast %cst_66 : f32 to vector<8x128xf32>
    %171 = arith.divf %170, %169 : vector<8x128xf32>
    %cst_67 = arith.constant 1.06140542 : f32
    %172 = vector.broadcast %cst_67 : f32 to vector<8x128xf32>
    %173 = arith.mulf %172, %171 : vector<8x128xf32>
    %cst_68 = arith.constant -1.45315206 : f32
    %174 = vector.broadcast %cst_68 : f32 to vector<8x128xf32>
    %175 = arith.addf %173, %174 : vector<8x128xf32>
    %176 = arith.mulf %175, %171 : vector<8x128xf32>
    %cst_69 = arith.constant 1.42141378 : f32
    %177 = vector.broadcast %cst_69 : f32 to vector<8x128xf32>
    %178 = arith.addf %176, %177 : vector<8x128xf32>
    %179 = arith.mulf %178, %171 : vector<8x128xf32>
    %cst_70 = arith.constant -0.284496725 : f32
    %180 = vector.broadcast %cst_70 : f32 to vector<8x128xf32>
    %181 = arith.addf %179, %180 : vector<8x128xf32>
    %182 = arith.mulf %181, %171 : vector<8x128xf32>
    %cst_71 = arith.constant 0.254829586 : f32
    %183 = vector.broadcast %cst_71 : f32 to vector<8x128xf32>
    %184 = arith.addf %182, %183 : vector<8x128xf32>
    %185 = arith.mulf %184, %171 : vector<8x128xf32>
    %cst_72 = arith.constant 0.000000e+00 : f32
    %186 = vector.broadcast %cst_72 : f32 to vector<8x128xf32>
    %187 = arith.subf %186, %165 : vector<8x128xf32>
    %188 = arith.mulf %187, %165 : vector<8x128xf32>
    %189 = math.exp %188 : vector<8x128xf32>
    %190 = arith.mulf %185, %189 : vector<8x128xf32>
    %cst_73 = arith.constant 1.000000e+00 : f32
    %191 = vector.broadcast %cst_73 : f32 to vector<8x128xf32>
    %192 = arith.subf %191, %190 : vector<8x128xf32>
    %cst_74 = arith.constant 0.000000e+00 : f32
    %193 = vector.broadcast %cst_74 : f32 to vector<8x128xf32>
    %194 = arith.cmpf oge, %164, %193 : vector<8x128xf32>
    %cst_75 = arith.constant 0.000000e+00 : f32
    %195 = vector.broadcast %cst_75 : f32 to vector<8x128xf32>
    %196 = arith.subf %195, %192 : vector<8x128xf32>
    %197 = arith.select %194, %192, %196 : vector<8x128xi1>, vector<8x128xf32>
    %cst_76 = arith.constant 1.000000e+00 : f32
    %198 = vector.broadcast %cst_76 : f32 to vector<8x128xf32>
    %199 = arith.addf %198, %197 : vector<8x128xf32>
    %200 = arith.mulf %162, %199 : vector<8x128xf32>
    %201 = arith.truncf %200 : vector<8x128xf32> to vector<8x128xbf16>
    %c0_77 = arith.constant 0 : index
    %c0_78 = arith.constant 0 : index
    %c0_79 = arith.constant 0 : index
    %202 = vector.load %arg15[%c0_77, %c0_78, %c0_79] : memref<1x128x32xbf16, #tpu.memory_space<vmem>>, vector<1x128x32xbf16>
    %203 = vector.shape_cast %202 : vector<1x128x32xbf16> to vector<128x32xbf16>
    %cst_80 = arith.constant dense<0.000000e+00> : vector<8x32xf32>
    %204 = tpu.matmul %201, %203, %cst_80 {dimension_numbers = #tpu.dot_dimension_numbers<[1], [0], [0], [1], [0, 0, 1, 1], [], []>} : vector<8x128xbf16>, vector<128x32xbf16>, vector<8x32xf32> -> vector<8x32xf32>
    %205 = arith.addf %126, %204 : vector<8x32xf32>
    %c0_81 = arith.constant 0 : index
    %c0_82 = arith.constant 0 : index
    %c0_83 = arith.constant 0 : index
    %206 = vector.load %arg16[%c0_81, %c0_82, %c0_83] : memref<1x1x32xf32, #tpu.memory_space<vmem>>, vector<1x1x32xf32>
    %207 = vector.shape_cast %206 : vector<1x1x32xf32> to vector<1x32xf32>
    %208 = vector.broadcast %207 : vector<1x32xf32> to vector<8x32xf32>
    %209 = arith.addf %205, %208 : vector<8x32xf32>
    %c0_84 = arith.constant 0 : index
    %c0_85 = arith.constant 0 : index
    %210 = vector.load %arg20[%c0_84, %c0_85] : memref<8x32xf32, #tpu.memory_space<vmem>>, vector<8x32xf32>
    tpu.vector_store %arg20[%c0_84, %c0_85], %209 {strides = array<i32>} : memref<8x32xf32, #tpu.memory_space<vmem>>, vector<8x32xf32>,
    %c1_i32 = arith.constant 1 : i32
    %211 = arith.cmpi eq, %arg1, %c1_i32 : i32
    %212 = arith.extui %211 : i1 to i32
    %c0_i32_86 = arith.constant 0 : i32
    %213 = arith.cmpi ne, %212, %c0_i32_86 : i32
    scf.if %213 {
      %214 = vector.extract_strided_slice %209 {offsets = [0, 0], sizes = [1, 32], strides = [1, 1]} : vector<8x32xf32> to vector<1x32xf32>
      %c0_87 = arith.constant 0 : index
      %c0_88 = arith.constant 0 : index
      %215 = vector.load %arg17[%c0_87, %c0_88] : memref<1x32xf32, #tpu.memory_space<vmem>>, vector<1x32xf32>
      %c0_89 = arith.constant 0 : index
      %c0_90 = arith.constant 0 : index
      %216 = vector.load %arg18[%c0_89, %c0_90] : memref<1x32xf32, #tpu.memory_space<vmem>>, vector<1x32xf32>
      %cst_91 = arith.constant dense<0.000000e+00> : vector<1xf32>
      %217 = vector.multi_reduction <add>, %214, %cst_91 [1] : vector<1x32xf32> to vector<1xf32>
      %218 = vector.shape_cast %217 : vector<1xf32> to vector<1x1xf32>
      %cst_92 = arith.constant 3.200000e+01 : f32
      %219 = vector.broadcast %cst_92 : f32 to vector<1x1xf32>
      %220 = arith.divf %218, %219 : vector<1x1xf32>
      %221 = vector.broadcast %220 : vector<1x1xf32> to vector<1x32xf32>
      %222 = arith.subf %214, %221 : vector<1x32xf32>
      %223 = arith.mulf %222, %222 : vector<1x32xf32>
      %cst_93 = arith.constant dense<0.000000e+00> : vector<1xf32>
      %224 = vector.multi_reduction <add>, %223, %cst_93 [1] : vector<1x32xf32> to vector<1xf32>
      %225 = vector.shape_cast %224 : vector<1xf32> to vector<1x1xf32>
      %cst_94 = arith.constant 3.200000e+01 : f32
      %226 = vector.broadcast %cst_94 : f32 to vector<1x1xf32>
      %227 = arith.divf %225, %226 : vector<1x1xf32>
      %228 = vector.broadcast %220 : vector<1x1xf32> to vector<1x32xf32>
      %229 = arith.subf %214, %228 : vector<1x32xf32>
      %cst_95 = arith.constant 9.99999997E-7 : f32
      %230 = vector.broadcast %cst_95 : f32 to vector<1x1xf32>
      %231 = arith.addf %227, %230 : vector<1x1xf32>
      %232 = math.rsqrt %231 : vector<1x1xf32>
      %233 = vector.broadcast %232 : vector<1x1xf32> to vector<1x32xf32>
      %234 = arith.mulf %229, %233 : vector<1x32xf32>
      %235 = arith.mulf %234, %215 : vector<1x32xf32>
      %236 = arith.addf %235, %216 : vector<1x32xf32>
      %c0_96 = arith.constant 0 : index
      %c0_97 = arith.constant 0 : index
      %c0_98 = arith.constant 0 : index
      %237 = vector.load %arg19[%c0_96, %c0_97, %c0_98] : memref<1x1x32xf32, #tpu.memory_space<vmem>>, vector<1x1x32xf32>
      %238 = vector.shape_cast %237 : vector<1x1x32xf32> to vector<1x32xf32>
      %239 = vector.shape_cast %236 : vector<1x32xf32> to vector<1x1x32xf32>
      tpu.vector_store %arg19[%c0_96, %c0_97, %c0_98], %239 {strides = array<i32>} : memref<1x1x32xf32, #tpu.memory_space<vmem>>, vector<1x1x32xf32>,
    } else {
    }
    return
  }
  func.func @transform_0(%arg0: i32, %arg1: i32) -> (i32, i32, i32) {
    %c0_i32 = arith.constant 0 : i32
    %c0_i32_0 = arith.constant 0 : i32
    %c0_i32_1 = arith.constant 0 : i32
    return %arg0, %c0_i32, %c0_i32_0 : i32, i32, i32
  }
  func.func @transform_1(%arg0: i32, %arg1: i32) -> (i32, i32) {
    %c0_i32 = arith.constant 0 : i32
    %c0_i32_0 = arith.constant 0 : i32
    %c0_i32_1 = arith.constant 0 : i32
    return %c0_i32, %c0_i32_0 : i32, i32
  }
  func.func @transform_2(%arg0: i32, %arg1: i32) -> (i32, i32) {
    %c0_i32 = arith.constant 0 : i32
    %c0_i32_0 = arith.constant 0 : i32
    %c0_i32_1 = arith.constant 0 : i32
    return %c0_i32, %c0_i32_0 : i32, i32
  }
  func.func @transform_3(%arg0: i32, %arg1: i32) -> (i32, i32, i32) {
    %c0_i32 = arith.constant 0 : i32
    %c0_i32_0 = arith.constant 0 : i32
    %c0_i32_1 = arith.constant 0 : i32
    return %arg1, %c0_i32, %c0_i32_0 : i32, i32, i32
  }
  func.func @transform_4(%arg0: i32, %arg1: i32) -> (i32, i32, i32) {
    %c0_i32 = arith.constant 0 : i32
    %c0_i32_0 = arith.constant 0 : i32
    %c0_i32_1 = arith.constant 0 : i32
    return %arg1, %c0_i32, %c0_i32_0 : i32, i32, i32
  }
  func.func @transform_5(%arg0: i32, %arg1: i32) -> (i32, i32, i32) {
    %c0_i32 = arith.constant 0 : i32
    %c0_i32_0 = arith.constant 0 : i32
    %c0_i32_1 = arith.constant 0 : i32
    return %arg1, %c0_i32, %c0_i32_0 : i32, i32, i32
  }
  func.func @transform_6(%arg0: i32, %arg1: i32) -> (i32, i32, i32) {
    %c0_i32 = arith.constant 0 : i32
    %c0_i32_0 = arith.constant 0 : i32
    %c0_i32_1 = arith.constant 0 : i32
    return %arg1, %c0_i32, %c0_i32_0 : i32, i32, i32
  }
  func.func @transform_7(%arg0: i32, %arg1: i32) -> (i32, i32, i32) {
    %c0_i32 = arith.constant 0 : i32
    %c0_i32_0 = arith.constant 0 : i32
    %c0_i32_1 = arith.constant 0 : i32
    return %arg1, %c0_i32, %c0_i32_0 : i32, i32, i32
  }
  func.func @transform_8(%arg0: i32, %arg1: i32) -> (i32, i32, i32) {
    %c0_i32 = arith.constant 0 : i32
    %c0_i32_0 = arith.constant 0 : i32
    %c0_i32_1 = arith.constant 0 : i32
    return %arg1, %c0_i32, %c0_i32_0 : i32, i32, i32
  }
  func.func @transform_9(%arg0: i32, %arg1: i32) -> (i32, i32, i32) {
    %c0_i32 = arith.constant 0 : i32
    %c0_i32_0 = arith.constant 0 : i32
    %c0_i32_1 = arith.constant 0 : i32
    return %arg1, %c0_i32, %c0_i32_0 : i32, i32, i32
  }
  func.func @transform_10(%arg0: i32, %arg1: i32) -> (i32, i32, i32) {
    %c0_i32 = arith.constant 0 : i32
    %c0_i32_0 = arith.constant 0 : i32
    %c0_i32_1 = arith.constant 0 : i32
    return %arg1, %c0_i32, %c0_i32_0 : i32, i32, i32
  }
  func.func @transform_11(%arg0: i32, %arg1: i32) -> (i32, i32, i32) {
    %c0_i32 = arith.constant 0 : i32
    %c0_i32_0 = arith.constant 0 : i32
    %c0_i32_1 = arith.constant 0 : i32
    return %arg1, %c0_i32, %c0_i32_0 : i32, i32, i32
  }
  func.func @transform_12(%arg0: i32, %arg1: i32) -> (i32, i32, i32) {
    %c0_i32 = arith.constant 0 : i32
    %c0_i32_0 = arith.constant 0 : i32
    %c0_i32_1 = arith.constant 0 : i32
    return %arg1, %c0_i32, %c0_i32_0 : i32, i32, i32
  }
  func.func @transform_13(%arg0: i32, %arg1: i32) -> (i32, i32, i32) {
    %c0_i32 = arith.constant 0 : i32
    %c0_i32_0 = arith.constant 0 : i32
    %c0_i32_1 = arith.constant 0 : i32
    return %arg1, %c0_i32, %c0_i32_0 : i32, i32, i32
  }
  func.func @transform_14(%arg0: i32, %arg1: i32) -> (i32, i32, i32) {
    %c0_i32 = arith.constant 0 : i32
    %c0_i32_0 = arith.constant 0 : i32
    %c0_i32_1 = arith.constant 0 : i32
    return %arg1, %c0_i32, %c0_i32_0 : i32, i32, i32
  }
  func.func @transform_15(%arg0: i32, %arg1: i32) -> (i32, i32) {
    %c0_i32 = arith.constant 0 : i32
    %c0_i32_0 = arith.constant 0 : i32
    %c0_i32_1 = arith.constant 0 : i32
    return %c0_i32, %c0_i32_0 : i32, i32
  }
  func.func @transform_16(%arg0: i32, %arg1: i32) -> (i32, i32) {
    %c0_i32 = arith.constant 0 : i32
    %c0_i32_0 = arith.constant 0 : i32
    %c0_i32_1 = arith.constant 0 : i32
    return %c0_i32, %c0_i32_0 : i32, i32
  }
  func.func @transform_17(%arg0: i32, %arg1: i32) -> (i32, i32, i32) {
    %c0_i32 = arith.constant 0 : i32
    %c0_i32_0 = arith.constant 0 : i32
    %c0_i32_1 = arith.constant 0 : i32
    return %arg0, %c0_i32, %c0_i32_0 : i32, i32, i32
  }
}

</mosaic_0001>

<bundles_post_ra>
// kernel: vision_encoder_forward.1
= control target key start
LH: loop header
LB: loop body
LE: loop exit
PB: predicated region body
PF: predicated region fallthrough
CT: control target
= control target key end

     0   :  { %s3578_s0 = inlined_call_operand.vmem [shape: bf16[2,8,768], index: 0, kind: input, shape index: {}]   ;;  %s3579_s1 = inlined_call_operand.vmem [shape: bf16[768,32], index: 1, kind: input, shape index: {}]   ;;  %s3580_s2 = inlined_call_operand.vmem [shape: f32[8,32], index: 2, kind: input, shape index: {}]   ;;  %s3581_s3 = inlined_call_operand.vmem [shape: f32[2,1,32], index: 3, kind: input, shape index: {}]   ;;  %s3582_s4 = inlined_call_operand.vmem [shape: f32[2,1,32], index: 4, kind: input, shape index: {}]   ;;  %s3583_s5 = inlined_call_operand.vmem [shape: bf16[2,32,96], index: 5, kind: input, shape index: {}]   ;;  %s3584_s6 = inlined_call_operand.vmem [shape: f32[2,1,96], index: 6, kind: input, shape index: {}]   ;;  %s3585_s7 = inlined_call_operand.vmem [shape: bf16[2,32,32], index: 7, kind: input, shape index: {}]   ;;  %s3586_s8 = inlined_call_operand.vmem [shape: f32[2,1,32], index: 8, kind: input, shape index: {}]   ;;  %s3587_s9 = inlined_call_operand.vmem [shape: f32[2,1,32], index: 9, kind: input, shape index: {}]   ;;  %s3588_s10 = inlined_call_operand.vmem [shape: f32[2,1,32], index: 10, kind: input, shape index: {}]   ;;  %s3589_s11 = inlined_call_operand.vmem [shape: bf16[2,32,128], index: 11, kind: input, shape index: {}]   ;;  %s3590_s12 = inlined_call_operand.vmem [shape: f32[2,1,128], index: 12, kind: input, shape index: {}]   ;;  %s3591_s13 = inlined_call_operand.vmem [shape: bf16[2,128,32], index: 13, kind: input, shape index: {}]   ;;  %s3592_s14 = inlined_call_operand.vmem [shape: f32[2,1,32], index: 14, kind: input, shape index: {}]   ;;  %s3593_s15 = inlined_call_operand.vmem [shape: f32[1,32], index: 15, kind: input, shape index: {}]   ;;  %s3594_s16 = inlined_call_operand.vmem [shape: f32[1,32], index: 16, kind: input, shape index: {}]   ;;  %s3595_s17 = inlined_call_operand.hbm [shape: f32[2,1,32], index: 17, kind: output, shape index: {}]  }
   0x1   :  { %3610 = sst [smem:[#allocation18_spill]] %s3578_s0 }
   0x2   :  { %3611 = sst [smem:[#allocation19_spill]] %s3579_s1 }
   0x3   :  { %3612 = sst [smem:[#allocation20_spill]] %s3580_s2 }
   0x4   :  { %3613 = sst [smem:[#allocation21_spill]] %s3582_s4 }
   0x5   :  { %3614 = sst [smem:[#allocation22_spill]] %s3583_s5 }
   0x6   :  { %3615 = sst [smem:[#allocation23_spill]] %s3585_s7 }
   0x7   :  { %3616 = sst [smem:[#allocation24_spill]] %s3593_s15 }
   0x8   :  { %3617 = sst [smem:[#allocation25_spill]] %s3594_s16 }
   0x9   :  { %3618 = sst [smem:[#allocation26_spill]] %s3595_s17 }
   0xa   :  { %22 = vsyncpa [#allocation4], 0 }
   0xb   :  { %24 = vsyncpa [#allocation4 + $0x1], 0  ;;  %s3066_s24 = smov 0   ;;  %s3068_s25 = smov 0  }
   0xc   :  { %s3070_s26 = smov 0   ;;  %s3072_s27 = smov 0  }
   0xd   :  { %s3074_s28 = smov 0   ;;  %s3076_s29 = smov 0  }
   0xe   :  { %s3078_s0 = smov 0   ;;  %s3080_s30 = smov 0  }
   0xf LB: > { %3619 = sst [smem:[#allocation6_spill]] %s2928_s24  ;;  %s2377_s18 = sadd.s32 4294967295, %s2956_s30   ;;  %s2956_s30 = sphi %s3080_s30, %s30_s30   ;;  %s2952_s0 = sphi %s3078_s0, %s3663_s0   ;;  %s2948_s29 = sphi %s3076_s29, %s3662_s29   ;;  %s2944_s28 = sphi %s3074_s28, %s3661_s28   ;;  %s2940_s27 = sphi %s3072_s27, %s3660_s27   ;;  %s2936_s26 = sphi %s3070_s26, %s3659_s26   ;;  %s2932_s25 = sphi %s3068_s25, %s3665_s25   ;;  %s2928_s24 = sphi %s3066_s24, %s3664_s24  }
  0x10   : > { %3620 = sst [smem:[#allocation7_spill]] %s2936_s26  ;;  %s2378_s19 = sadd.s32 4294967294, %s2956_s30  }
  0x11   : > { %3621 = sst [smem:[#allocation8_spill]] %s2940_s27  ;;  %s39_s1 = sadd.s32 1, %s2948_s29 }
  0x12   : > { %3622 = sst [smem:[#allocation9_spill]] %s2944_s28  ;;  %p40_p0 = scmp.ge.s32.totalorder %s39_s1, 2 }
  0x13   : > { %3623 = sst [smem:[#allocation10_spill]] %s2948_s29  ;;  %s42_s20 = sadd.s32 1, %s2952_s0 }
  0x14   : > { %3624 = sst [smem:[#allocation11_spill]] %s2952_s0  ;;  %p481_p1 = scmp.ne.s32.totalorder %s2936_s26, %s2932_s25 }
  0x15   : > { %3625 = sst [smem:[#allocation12_spill]] %s2956_s30  ;;  %p482_p2 = scmp.eq.s32.totalorder %s2377_s18, 3 }
  0x16   : > { %s3667_s1 = smov (%p40_p0, %s39_s1), 0  ;;  %s3669_s20 = smov (!%p40_p0, %s42_s20), %s2952_s0 }
  0x17   : > { %3626 = sst [smem:[#allocation13_spill]] %s3667_s1  ;;  %p3115_p3 = por %p482_p2, %p481_p1 }
  0x18   : > { %p487_p4 = scmp.ne.s32.totalorder %s2932_s25, %s2928_s24  ;;  %p44_p5 = scmp.ge.s32.totalorder %s3669_s20, 2 }
  0x19   : > { %s3627_s21 = scalar_select %p3115_p3, 1, 0 }
  0x1a   : > { %p488_p6 = scmp.eq.s32.totalorder %s2378_s19, 3  ;;  %p2381_p7 = scmp.ge.s32.totalorder %s2956_s30, 1 }
  0x1b   : > { %3628 = sst [smem:[#allocation14_spill]] %s3627_s21  ;;  %p606_p8 = scmp.lt.s32.totalorder %s2956_s30, 5 }
  0x1c   : > { %s3671_s20 = smov (%p44_p5, %s3669_s20), 0  ;;  %p3125_p9 = por %p488_p6, %p487_p4 }
  0x1d   : > { %3629 = sst [smem:[#allocation15_spill]] %s3671_s20  ;;  %p607_p10 = pnand %p2381_p7, %p606_p8 }
  0x1e   : > { %s3630_s22 = scalar_select %p3125_p9, 1, 0 }
  0x1f   : > { %s468_s23 = ssub.s32 %s2952_s0, %s3671_s20  ;;  %s471_s18 = sadd.s32 1, %s2936_s26 }
  0x20   : > { %3631 = sst [smem:[#allocation16_spill]] %s3630_s22  ;;  %p469_p11 = scmp.eq.s32.totalorder %s468_s23, 0 }
  0x21   : > { %610 = sbr.rel (%p607_p10) target bundleno = 3272 (0xcc8), region = 88  ;;  %p701_p12 = scmp.lt.s32.totalorder (!%p607_p10), %s2944_s28, 1 }
  0x22   : > { %s3133_s1 = scalar_select %p469_p11, %s2936_s26, %s471_s18  }
  0x23   : > { %p706_p13 = scmp.lt.s32.totalorder (!%p607_p10), %s2940_s27, 1  ;;  %s3634_s17 = sld [smem:[#allocation18_spill]] (!%p607_p10) }
  0x24   : > { %3632 = sst [smem:[#allocation17_spill]] %s3133_s1  ;;  %s3635_s5 = sld [smem:[#allocation22_spill]] (!%p607_p10) }
  0x25   : > { %s3636_s7 = sld [smem:[#allocation23_spill]] (!%p607_p10)  ;;  %s3637_s15 = sand.u32 (!%p607_p10), 1, %s2932_s25  }
  0x26   : > { %s3203_s16 = scalar_lea.vmem (!%p607_p10), [#allocation3], %s3637_s15  ;;  %s3638_s4 = sld [smem:[#allocation8_spill]] (!%p607_p10) }
  0x28   : > { %s702_s29 = scalar_select %p701_p12, %s2944_s28, 1 }
  0x29   : > { %s3140_s24 = scalar_select %p706_p13, %s2940_s27, 1 }
  0x2a   : > { %s2679_s23 = smul.u32 24, %s702_s29 }
  0x2b   : > { %s2483_s28 = sshll.u32 %s3140_s24, 4 }
  0x2c   : > { %s3153_s21 = scalar_lea.vmem %s3634_s17, %s2679_s23  ;;  %s3159_s2 = scalar_lea.vmem %s3635_s5, %s2483_s28 }
  0x2d   : > { %s3168_s0 = scalar_lea.vmem %s3636_s7, %s2483_s28  ;;  %s733_s5 = scalar_lea.vmem %s3588_s10, %s3140_s24 }
  0x2e   : > { %s3185_s29 = scalar_lea.vmem %s3589_s11, %s2483_s28  ;;  %s2486_s7 = sshll.u32 %s3140_s24, 6 }
  0x2f   : > { %s749_s17 = scalar_lea.vmem %s3592_s14, %s3140_s24  ;;  %s3199_s23 = scalar_lea.vmem %s3591_s13, %s2486_s7 }
  0x30   : > { %p2391_p0 = scmp.ne.s32.totalorder %s3638_s4, 0 }
  0x31   : > { %s3639_s19 = sld [smem:[#allocation19_spill]] (!%p2391_p0)  ;;  %v755_v31 = vld [vmem:[%s3153_s21] sm:$0xff] (!%p2391_p0)  ;;  %v756_v36 = vld [vmem:[%s3153_s21 + $0x8] sm:$0xff] (!%p2391_p0)  ;;  %v757_v48 = vld [vmem:[%s3153_s21 + $0x10] sm:$0xff] (!%p2391_p0)  ;;  %s3640_s15 = sld [smem:[#allocation20_spill]] (!%p2391_p0)  ;;  %vm1284_vm0 = vcmask (!%p2391_p0), 261120  }
  0x32   : > { %754 = sbr.rel (%p2391_p0) target bundleno = 338 (0x152), region = 92  ;;  %v2392_v32 = vcombine.low (!%p2391_p0), %v755_v31, %v755_v31  ;;  %v2393_v33 = vcombine.high (!%p2391_p0), %v755_v31, %v755_v31  ;;  %v2394_v37 = vcombine.low (!%p2391_p0), %v756_v36, %v756_v36  ;;  %v2395_v38 = vcombine.high (!%p2391_p0), %v756_v36, %v756_v36 }
  0x33   : > { %v2397_v50 = vcombine.high (!%p2391_p0), %v757_v48, %v757_v48  ;;  %v2396_v56 = vcombine.low (!%p2391_p0), %v757_v48, %v757_v48 }
  0x34   : > { %1196 = vmatprep.mubr.bf16.mxu0 (!%p2391_p0), %v2393_v33  ;;  %1236 = vmatprep.mubr.bf16.mxu1 (!%p2391_p0), %v2395_v38 }
  0x37   : > { %v2768_v0 = vld [vmem:[%s3639_s19 + $0x40] sm:$0xff] (!%p2391_p0)   ;;  %v2772_v4 = vld [vmem:[%s3639_s19 + $0x48] sm:$0xff] (!%p2391_p0)   ;;  %v2776_v8 = vld [vmem:[%s3639_s19 + $0x50] sm:$0xff] (!%p2391_p0)  }
  0x38   : > { %v2769_v1 = vld [vmem:[%s3639_s19] sm:$0xff] (!%p2391_p0)   ;;  %2487 = vmatprep.subr.bf16.mxu0 (!%p2391_p0), %v2768_v0  ;;  %v2773_v5 = vld [vmem:[%s3639_s19 + $0x8] sm:$0xff] (!%p2391_p0)   ;;  %v2777_v9 = vld [vmem:[%s3639_s19 + $0x10] sm:$0xff] (!%p2391_p0)  }
  0x39   : > { %v2770_v2 = vld [vmem:[%s3639_s19 + $0xc0] sm:$0xff]   ;;  %2488 = vmatpush3.bf16.msra.mxu0 %v2769_v1  ;;  %v2774_v6 = vld [vmem:[%s3639_s19 + $0xc8] sm:$0xff]   ;;  %v2778_v10 = vld [vmem:[%s3639_s19 + $0xd0] sm:$0xff]  }
  0x3a   : > { %v2771_v3 = vld [vmem:[%s3639_s19 + $0x80] sm:$0xff]   ;;  %2509 = vmatprep.subr.bf16.mxu1 %v2770_v2  ;;  %2489 = vmatprep.subr.bf16.mxu0 %v2772_v4  ;;  %v2775_v7 = vld [vmem:[%s3639_s19 + $0x88] sm:$0xff]   ;;  %v2779_v11 = vld [vmem:[%s3639_s19 + $0x90] sm:$0xff]  }
  0x3b   : > { %2510 = vmatpush3.bf16.msra.mxu1 %v2771_v3  ;;  %v2780_v12 = vld [vmem:[%s3639_s19 + $0x58] sm:$0xff]   ;;  %v2784_v16 = vld [vmem:[%s3639_s19 + $0x60] sm:$0xff]   ;;  %v2788_v20 = vld [vmem:[%s3639_s19 + $0x68] sm:$0xff]  }
  0x3c   : > { %2511 = vmatprep.subr.bf16.mxu1 %v2774_v6  ;;  %v2781_v13 = vld [vmem:[%s3639_s19 + $0x18] sm:$0xff]   ;;  %v2785_v17 = vld [vmem:[%s3639_s19 + $0x20] sm:$0xff]   ;;  %v2789_v21 = vld [vmem:[%s3639_s19 + $0x28] sm:$0xff]  }
  0x3d   : > { %2490 = vmatpush3.bf16.msra.mxu0 %v2773_v5  ;;  %v2782_v14 = vld [vmem:[%s3639_s19 + $0xd8] sm:$0xff]   ;;  %v2786_v18 = vld [vmem:[%s3639_s19 + $0xe0] sm:$0xff]   ;;  %v2790_v22 = vld [vmem:[%s3639_s19 + $0xe8] sm:$0xff]  }
  0x3e   : > { %2491 = vmatprep.subr.bf16.mxu0 %v2776_v8  ;;  %v2783_v15 = vld [vmem:[%s3639_s19 + $0x98] sm:$0xff]   ;;  %v2787_v19 = vld [vmem:[%s3639_s19 + $0xa0] sm:$0xff]   ;;  %v2791_v23 = vld [vmem:[%s3639_s19 + $0xa8] sm:$0xff]  }
  0x3f   : > { %2512 = vmatpush3.bf16.msra.mxu1 %v2775_v7  ;;  %v2792_v24 = vld [vmem:[%s3639_s19 + $0x70] sm:$0xff]   ;;  %v2796_v28 = vld [vmem:[%s3639_s19 + $0x78] sm:$0xff]   ;;  %v2802_v35 = vld [vmem:[%s3639_s19 + $0x140] sm:$0xff]  }
  0x40   : > { %2513 = vmatprep.subr.bf16.mxu1 %v2778_v10  ;;  %v2793_v25 = vld [vmem:[%s3639_s19 + $0x30] sm:$0xff]   ;;  %v2797_v29 = vld [vmem:[%s3639_s19 + $0x38] sm:$0xff]   ;;  %v2805_v39 = vld [vmem:[%s3639_s19 + $0x100] sm:$0xff]  }
  0x41   : > { %2492 = vmatpush3.bf16.msra.mxu0 %v2777_v9  ;;  %v2794_v26 = vld [vmem:[%s3639_s19 + $0xf0] sm:$0xff]   ;;  %v2798_v30 = vld [vmem:[%s3639_s19 + $0xf8] sm:$0xff]   ;;  %v2806_v40 = vld [vmem:[%s3639_s19 + $0x148] sm:$0xff]  }
  0x42   : > { %2493 = vmatprep.subr.bf16.mxu0 %v2780_v12  ;;  %v2795_v27 = vld [vmem:[%s3639_s19 + $0xb0] sm:$0xff]   ;;  %v2801_v34 = vld [vmem:[%s3639_s19 + $0xb8] sm:$0xff]   ;;  %v2807_v41 = vld [vmem:[%s3639_s19 + $0x108] sm:$0xff]  }
  0x43   : > { %2514 = vmatpush3.bf16.msra.mxu1 %v2779_v11  ;;  %v2808_v42 = vld [vmem:[%s3639_s19 + $0x150] sm:$0xff]   ;;  %v2810_v44 = vld [vmem:[%s3639_s19 + $0x158] sm:$0xff]   ;;  %v2812_v46 = vld [vmem:[%s3639_s19 + $0x160] sm:$0xff]  }
  0x44   : > { %2515 = vmatprep.subr.bf16.mxu1 %v2782_v14  ;;  %v2809_v43 = vld [vmem:[%s3639_s19 + $0x110] sm:$0xff]   ;;  %v2811_v45 = vld [vmem:[%s3639_s19 + $0x118] sm:$0xff]   ;;  %v2813_v47 = vld [vmem:[%s3639_s19 + $0x120] sm:$0xff]  }
  0x45   : > { %2494 = vmatpush3.bf16.msra.mxu0 %v2781_v13  ;;  %v2814_v49 = vld [vmem:[%s3639_s19 + $0x168] sm:$0xff]   ;;  %v2816_v52 = vld [vmem:[%s3639_s19 + $0x170] sm:$0xff]   ;;  %v2818_v54 = vld [vmem:[%s3639_s19 + $0x178] sm:$0xff]  }
  0x46   : > { %2495 = vmatprep.subr.bf16.mxu0 %v2784_v16  ;;  %v2815_v51 = vld [vmem:[%s3639_s19 + $0x128] sm:$0xff]   ;;  %v2817_v53 = vld [vmem:[%s3639_s19 + $0x130] sm:$0xff]   ;;  %v2819_v55 = vld [vmem:[%s3639_s19 + $0x138] sm:$0xff]  }
  0x47   : > { %2516 = vmatpush3.bf16.msra.mxu1 %v2783_v15  ;;  %v854_v58 = vld [vmem:[%s3640_s15] sm:$0xff] }
  0x48   : > { %2517 = vmatprep.subr.bf16.mxu1 %v2786_v18 }
  0x49   : > { %2496 = vmatpush3.bf16.msra.mxu0 %v2785_v17 }
  0x4a   : > { %2497 = vmatprep.subr.bf16.mxu0 %v2788_v20 }
  0x4b   : > { %2518 = vmatpush3.bf16.msra.mxu1 %v2787_v19 }
  0x4c   : > { %2519 = vmatprep.subr.bf16.mxu1 %v2790_v22 }
  0x4d   : > { %2498 = vmatpush3.bf16.msra.mxu0 %v2789_v21 }
  0x4e   : > { %2499 = vmatprep.subr.bf16.mxu0 %v2792_v24 }
  0x4f   : > { %2520 = vmatpush3.bf16.msra.mxu1 %v2791_v23 }
  0x50   : > { %2521 = vmatprep.subr.bf16.mxu1 %v2794_v26 }
  0x51   : > { %2500 = vmatpush3.bf16.msra.mxu0 %v2793_v25 }
  0x52   : > { %2501 = vmatprep.subr.bf16.mxu0 %v2796_v28 }
  0x53   : > { %2522 = vmatpush3.bf16.msra.mxu1 %v2795_v27 }
  0x54   : > { %2523 = vmatprep.subr.bf16.mxu1 %v2798_v30 }
  0x55   : > { %2502 = vmatpush3.bf16.msra.mxu0 %v2797_v29 }
  0x56   : > { %2531 = vmatprep.subr.bf16.mxu0 %v2802_v35 }
  0x57   : > { %2524 = vmatpush3.bf16.msra.mxu1 %v2801_v34 }
  0x58   : > { %1197 = vmatmul.mubr.bf16.vlgmr.msra.gmra.mrb[0].mxu0 %v2392_v32 }
  0x59   : > { %2532 = vmatpush3.bf16.msra.mxu0 %v2805_v39  ;;  %1276 = vmatprep.mubr.bf16.mxu0 %v2397_v50 }
  0x5a   : > { %1237 = vmatmul.mubr.bf16.vlgmr.msra.gmra.mrb[0].mxu1 %v2394_v37  ;;  %2533 = vmatprep.subr.bf16.mxu0 %v2806_v40 }
  0x5d   : > { %2534 = vmatpush3.bf16.msra.mxu0 %v2807_v41 }
  0x5e   : > { %2535 = vmatprep.subr.bf16.mxu0 %v2808_v42 }
  0x61   : > { %2536 = vmatpush3.bf16.msra.mxu0 %v2809_v43 }
  0x62   : > { %2537 = vmatprep.subr.bf16.mxu0 %v2810_v44 }
  0x65   : > { %2538 = vmatpush3.bf16.msra.mxu0 %v2811_v45 }
  0x66   : > { %2539 = vmatprep.subr.bf16.mxu0 %v2812_v46 }
  0x69   : > { %2540 = vmatpush3.bf16.msra.mxu0 %v2813_v47 }
  0x6a   : > { %2541 = vmatprep.subr.bf16.mxu0 %v2814_v49 }
  0x6d   : > { %2542 = vmatpush3.bf16.msra.mxu0 %v2815_v51 }
  0x6e   : > { %2543 = vmatprep.subr.bf16.mxu0 %v2816_v52 }
  0x71   : > { %2544 = vmatpush3.bf16.msra.mxu0 %v2817_v53 }
  0x72   : > { %2545 = vmatprep.subr.bf16.mxu0 %v2818_v54 }
  0x75   : > { %2546 = vmatpush3.bf16.msra.mxu0 %v2819_v55 }
  0x78   : > { %1277 = vmatmul.mubr.bf16.vlgmr.msra.gmra.mrb[4].mxu0 %v2396_v56 }
 0x12b   : > { %v2503_v57 = vpop.f32.mrb[0].mxu0 }
 0x12c   : > { %v2504_v59 = vpop.f32.mrb[1].mxu0 }
 0x12d   : > { %v2505_v60 = vadd.f32 %v2504_v59, %v2503_v57  ;;  %v2506_v61 = vpop.f32.mrb[2].mxu0  ;;  %v2525_v62 = vpop.f32.mrb[0].mxu1 }
 0x12e   : > { %v2507_v63 = vpop.f32.mrb[3].mxu0  ;;  %v2526_v0 = vpop.f32.mrb[1].mxu1 }
 0x12f   : > { %v1199_v1 = vadd.f32 %v2505_v60, %v854_v58  ;;  %v2527_v2 = vadd.f32 %v2526_v0, %v2525_v62  ;;  %v2528_v3 = vpop.f32.mrb[2].mxu1 }
 0x130   : > { %v2529_v4 = vpop.f32.mrb[3].mxu1 }
 0x131   : > { %v1239_v5 = vadd.f32 %v2527_v2, %v1199_v1 }
 0x14b   : > { %v2547_v6 = vpop.f32.mrb[4].mxu0 }
 0x14c   : > { %v2548_v7 = vpop.f32.mrb[5].mxu0 }
 0x14d   : > { %v2549_v8 = vadd.f32 %v2548_v7, %v2547_v6  ;;  %v2550_v9 = vpop.f32.mrb[6].mxu0 }
 0x14e   : > { %v2551_v10 = vpop.f32.mrb[7].mxu0 }
 0x14f   : > { %v1279_v11 = vadd.f32 %v2549_v8, %v1239_v5 }
 0x151   : > { %1285 = vst.msk [vmem:[#allocation2] sm:$0xff] %vm1284_vm0, %v1279_v11 }
 0x152 PF: > { %vm1293_vm1 = vcmask 261120   ;;  %v2822_v19 = vld [vmem:[%s3159_s2] sm:$0xff]   ;;  %v2958_v20 = vmov 0.0   ;;  %vm2959_vm2 = vmmov 0   ;;  %v2823_v21 = vld [vmem:[%s3159_s2 + $0x8] sm:$0xff]   ;;  %s3641_s2 = scalar_lea.vmem %s3581_s3, %s3140_s24  ;;  %s3642_s21 = sld [smem:[#allocation21_spill]]  ;;  %v1287_v50 = vlaneseq }
 0x153   : > { %2587 = vmatprep.subr.bf16.mxu0 %v2958_v20  ;;  %2591 = vmatprep.mubr.msk.bf16.mxu0 %vm2959_vm2, %v2958_v20  ;;  %v2446_v26 = vld [vmem:[%s3641_s2] ss:$0 sm:$0xff]  ;;  %s3644_s7 = scalar_lea.vmem %s3584_s6, %s3140_s24  ;;  %s2960_s30 = smov 120   ;;  %vm1393_vm3 = vcmask 64512   ;;  %v2967_v52 = vmov -1e+30  }
 0x154   : > { %2588 = vmatpush3.bf16.msra.mxu0 %v2822_v19  ;;  %2607 = vmatprep.subr.bf16.mxu1 %v2958_v20  ;;  %v2448_v32 = vld [vmem:[%s3644_s7] ss:$0 sm:$0xff]  ;;  %s2961_s22 = smov 96   ;;  %s2962_s15 = smov 88   ;;  %v1288_v51 = vand.u32 127, %v1287_v50  ;;  %vm1457_vm5 = vcmask 1043456  }
 0x155   : > { %2589 = vmatprep.subr.bf16.mxu0 %v2958_v20  ;;  %2609 = vmatprep.mubr.msk.bf16.mxu1 %vm2959_vm2, %v2958_v20  ;;  %s2963_s4 = smov 80   ;;  %s2964_s28 = smov 112   ;;  %vm1844_vm6 = vcmask 130048   ;;  %vm1846_vm7 = vcmask 195584  }
 0x156   : > { %s2965_s2 = smov 72   ;;  %s2966_s20 = smov 104   ;;  %vm1289_vm4 = vcmp.lt.s32.totalorder %v1288_v51, 5 }
 0x157   : > { %v1290_v53 = vsel %vm1289_vm4, 0.0, %v2967_v52  ;;  %s2968_s27 = smov 64   ;;  %s2971_s26 = smov 40  }
 0x158   : > { %v3356_v12 = vld [vmem:[#allocation2] sm:$0xff]  ;;  %2590 = vmatpush3.bf16.msra.mxu0 %v2823_v21  ;;  %s3643_s18 = scalar_lea.vmem %s3642_s21, %s3140_s24  ;;  %s2969_s21 = smov 56  }
 0x159   : > { %v1294_v13 = vsel %vm1293_vm1, %v3356_v12, 0.0  ;;  %2595 = vmatprep.subr.bf16.mxu0 %v2958_v20  ;;  %v2447_v28 = vld [vmem:[%s3643_s18] ss:$0 sm:$0xff]  ;;  %s2970_s18 = smov 48   ;;  %s2972_s1 = smov 8  }
 0x15a   : > { %1295 = vadd.xlane.f32.xlu0 %v1294_v13  ;;  %s2973_s7 = smov 16  }
 0x1e7   : > { %v1296_v14 = vpop.xlane.xlu0 %1295 }
 0x1e8   : > { %v1298_v15 = vmul.f32 0.03125, %v1296_v14 }
 0x1ea   : > { %v1299_v16 = vsub.f32 %v3356_v12, %v1298_v15 }
 0x1ec   : > { %v1300_v17 = vmul.f32 %v1299_v16, %v1299_v16 }
 0x1ee   : > { %v1301_v18 = vsel %vm1293_vm1, %v1300_v17, 0.0 }
 0x1ef   : > { %1302 = vadd.xlane.f32.xlu0 %v1301_v18 }
 0x27c   : > { %v1303_v22 = vpop.xlane.xlu0 %1302 }
 0x27d   : > { %v1304_v23 = vmul.f32 0.03125, %v1303_v22 }
 0x27f   : > { %v1305_v24 = vadd.f32 1e-06, %v1304_v23 }
 0x281   : > { %2836 = vrsqrt.f32 %v1305_v24 }
 0x28b   : > { %v2837_v25 = vpop.eup %2836 }
 0x28c   : > { %v1307_v27 = vmul.f32 %v2837_v25, %v1299_v16 }
 0x28e   : > { %v1314_v29 = vmul.f32 %v2446_v26, %v1307_v27 }
 0x290   : > { %v1321_v30 = vadd.f32 %v2447_v28, %v1314_v29 }
 0x292   : > { %v1322_v31 = vpack.c.bf16 %v1321_v30, %v1321_v30 }
 0x294   : > { %2592 = vmatmul.mubr.msk.bf16.vlgmr.msra.gmra.mrb[0].mxu0 %vm1293_vm1, %v1322_v31 }
 0x295   : > { %2597 = vmatprep.mubr.msk.bf16.mxu0 %vm2959_vm2, %v2958_v20 }
 0x367   : > { %v1383_v33 = vpop.f32.mrb[0].mxu0 }
 0x368   : > { %v1384_v34 = vadd.f32 %v2448_v32, %v1383_v33  ;;  %v2593_v35 = vpop.f32.mrb[1].mxu0 }
 0x369   : > { %v1386_v36 = vpop.f32.mrb[2].mxu0 }
 0x36a   : > { %v3390_v37 = vpack.c.bf16 %v1384_v34, %v1384_v34  ;;  %v2594_v38 = vpop.f32.mrb[3].mxu0 }
 0x36c   : > { %1501 = vrot.lane.b32.xlu0 %v3390_v37, %s2960_s30  ;;  %1391 = vrot.lane.b32.xlu1 %v3390_v37, %s2961_s22  ;;  %s2974_s30 = smov 24  }
 0x370   : > { %1503 = vrot.lane.b32.xlu1 %v3390_v37, %s2962_s15  ;;  %s3645_s15 = scalar_lea.vmem %s3586_s8, %s3140_s24 }
 0x374   : > { %1613 = vrot.lane.b32.xlu1 %v3390_v37, %s2963_s4 }
 0x378   : > { %1611 = vrot.lane.b32.xlu1 %v3390_v37, %s2964_s28 }
 0x37c   : > { %1723 = vrot.lane.b32.xlu1 %v3390_v37, %s2965_s2  ;;  %s3646_s2 = scalar_lea.vmem %s3587_s9, %s3140_s24 }
 0x380   : > { %1721 = vrot.lane.b32.xlu1 %v3390_v37, %s2966_s20 }
 0x3de   : > { %v1392_v39 = vpop.permute.xlu1 %1391  ;;  %v1502_v44 = vpop.permute.xlu0 %1501 }
 0x3df   : > { %v1398_v40 = vsel %vm1393_vm3, %v1392_v39, 0 }
 0x3e0   : > { %2596 = vmatpush3.bf16.xpose.msra.mxu0 %v1398_v40 }
 0x3e1   : > { %2601 = vmatprep.subr.bf16.mxu0 %v2958_v20 }
 0x3e2   : > { %v1504_v41 = vpop.permute.xlu1 %1503 }
 0x3e3   : > { %v1509_v42 = vsel %vm1393_vm3, %v1504_v41, 0 }
 0x3e4   : > { %2608 = vmatpush3.bf16.xpose.msra.mxu1 %v1509_v42 }
 0x3e5   : > { %2619 = vmatprep.subr.bf16.mxu1 %v2958_v20 }
 0x3e6   : > { %v1614_v43 = vpop.permute.xlu1 %1613 }
 0x3e7   : > { %2598 = vmatmul.mubr.msk.bf16.vlgmr.msra.gmra.mrb[4].mxu0 %vm1393_vm3, %v3390_v37  ;;  %v1619_v46 = vsel %vm1393_vm3, %v1614_v43, 0 }
 0x3e8   : > { %2603 = vmatprep.mubr.msk.bf16.mxu0 %vm2959_vm2, %v2958_v20 }
 0x3ea   : > { %v1612_v45 = vpop.permute.xlu1 %1611 }
 0x3eb   : > { %2610 = vmatmul.mubr.msk.bf16.vlgmr.msra.gmra.mrb[0].mxu1 %vm1393_vm3, %v1502_v44 }
 0x3ec   : > { %2620 = vmatpush3.bf16.xpose.msra.mxu1 %v1619_v46  ;;  %2621 = vmatprep.mubr.msk.bf16.mxu1 %vm2959_vm2, %v2958_v20 }
 0x3ed   : > { %2631 = vmatprep.subr.bf16.mxu1 %v2958_v20 }
 0x3ee   : > { %v1724_v47 = vpop.permute.xlu1 %1723 }
 0x3ef   : > { %v1729_v48 = vsel %vm1393_vm3, %v1724_v47, 0 }
 0x3f2   : > { %v1722_v49 = vpop.permute.xlu1 %1721 }
 0x3f3   : > { %2622 = vmatmul.mubr.msk.bf16.vlgmr.msra.gmra.mrb[4].mxu1 %vm1393_vm3, %v1612_v45 }
 0x3f4   : > { %2632 = vmatpush3.bf16.xpose.msra.mxu1 %v1729_v48  ;;  %2633 = vmatprep.mubr.msk.bf16.mxu1 %vm2959_vm2, %v2958_v20 }
 0x3f5   : > { %2643 = vmatprep.subr.bf16.mxu1 %v2958_v20 }
 0x3fb   : > { %2634 = vmatmul.mubr.msk.bf16.vlgmr.msra.gmra.mrb[8].mxu1 %vm1393_vm3, %v1722_v49 }
 0x3fc   : > { %2647 = vmatprep.mubr.msk.bf16.mxu1 %vm2959_vm2, %v2958_v20 }
 0x4ba   : > { %v1434_v54 = vpop.f32.mrb[4].mxu0 }
 0x4bb   : > { %v1435_v55 = vadd.f32 %v1434_v54, %v1290_v53  ;;  %v2599_v56 = vpop.f32.mrb[5].mxu0 }
 0x4bc   : > { %v1437_v57 = vpop.f32.mrb[6].mxu0 }
 0x4bd   : > { %v2600_v58 = vpop.f32.mrb[7].mxu0  ;;  %v1440_v59 = vsel %vm1393_vm3, %v1435_v55, -inf }
 0x4be   : > { %v1545_v60 = vpop.f32.mrb[0].mxu1  ;;  %1441 = vmax.xlane.f32.xlu1 %v1440_v59 }
 0x4bf   : > { %v1546_v61 = vadd.f32 %v1545_v60, %v1290_v53  ;;  %v2611_v62 = vpop.f32.mrb[1].mxu1 }
 0x4c0   : > { %v1548_v63 = vpop.f32.mrb[2].mxu1 }
 0x4c1   : > { %v2612_v0 = vpop.f32.mrb[3].mxu1  ;;  %v1551_v1 = vsel %vm1393_vm3, %v1546_v61, -inf }
 0x4c2   : > { %1552 = vmax.xlane.f32.xlu0 %v1551_v1 }
 0x4c6   : > { %v1655_v2 = vpop.f32.mrb[4].mxu1 }
 0x4c7   : > { %v1656_v3 = vadd.f32 %v1655_v2, %v1290_v53  ;;  %v2623_v4 = vpop.f32.mrb[5].mxu1 }
 0x4c8   : > { %v1658_v5 = vpop.f32.mrb[6].mxu1  ;;  %v2824_v4 = vld [vmem:[%s3168_s0] sm:$0xff]  }
 0x4c9   : > { %v2624_v6 = vpop.f32.mrb[7].mxu1  ;;  %v1661_v7 = vsel %vm1393_vm3, %v1656_v3, -inf  ;;  %2644 = vmatpush3.bf16.msra.mxu1 %v2824_v4  ;;  %v2825_v5 = vld [vmem:[%s3168_s0 + $0x8] sm:$0xff]  }
 0x4ca   : > { %1662 = vmax.xlane.f32.xlu1 %v1661_v7  ;;  %2645 = vmatprep.subr.bf16.mxu1 %v2958_v20 }
 0x4cd   : > { %2646 = vmatpush3.bf16.msra.mxu1 %v2825_v5 }
 0x4ce   : > { %v1765_v8 = vpop.f32.mrb[8].mxu1  ;;  %2659 = vmatprep.subr.bf16.mxu1 %v2958_v20 }
 0x4cf   : > { %v1766_v9 = vadd.f32 %v1765_v8, %v1290_v53  ;;  %v2635_v10 = vpop.f32.mrb[9].mxu1 }
 0x4d0   : > { %v1768_v11 = vpop.f32.mrb[10].mxu1 }
 0x4d1   : > { %v2636_v13 = vpop.f32.mrb[11].mxu1  ;;  %v1771_v14 = vsel %vm1393_vm3, %v1766_v9, -inf }
 0x4d2   : > { %1772 = vmax.xlane.f32.xlu0 %v1771_v14 }
 0x54b   : > { %v1442_v15 = vpop.xlane.xlu1 %1441 }
 0x54c   : > { %v1443_v16 = vsub.f32 %v1435_v55, %v1442_v15 }
 0x54e   : > { %v1444_v17 = vmul.f32 1.442695, %v1443_v16 }
 0x54f   : > { %v1553_v18 = vpop.xlane.xlu0 %1552 }
 0x550   : > { %2838 = vpow2.f32 %v1444_v17  ;;  %v1554_v19 = vsub.f32 %v1546_v61, %v1553_v18 }
 0x552   : > { %v1555_v21 = vmul.f32 1.442695, %v1554_v19 }
 0x554   : > { %2840 = vpow2.f32 %v1555_v21 }
 0x557   : > { %v1663_v31 = vpop.xlane.xlu1 %1662 }
 0x558   : > { %v1664_v32 = vsub.f32 %v1656_v3, %v1663_v31 }
 0x55a   : > { %v2839_v22 = vpop.eup %2838  ;;  %v1665_v33 = vmul.f32 1.442695, %v1664_v32 }
 0x55b   : > { %v1446_v23 = vsel %vm1393_vm3, %v2839_v22, 0.0 }
 0x55c   : > { %1447 = vadd.xlane.f32.xlu1 %v1446_v23 }
 0x55e   : > { %v2841_v24 = vpop.eup %2840 }
 0x55f   : > { %v1773_v25 = vpop.xlane.xlu0 %1772  ;;  %v1557_v26 = vsel %vm1393_vm3, %v2841_v24, 0.0 }
 0x560   : > { %v1774_v27 = vsub.f32 %v1766_v9, %v1773_v25  ;;  %1558 = vadd.xlane.f32.xlu0 %v1557_v26 }
 0x562   : > { %v1775_v28 = vmul.f32 1.442695, %v1774_v27 }
 0x564   : > { %2842 = vpow2.f32 %v1775_v28 }
 0x565   : > { %2844 = vpow2.f32 %v1665_v33 }
 0x56d   : > { %1452 = vrot.lane.b32.xlu1 %v3390_v37, %s2968_s27 }
 0x56e   : > { %v2843_v29 = vpop.eup %2842 }
 0x56f   : > { %v1777_v30 = vsel %vm1393_vm3, %v2843_v29, 0.0  ;;  %v2845_v34 = vpop.eup %2844 }
 0x570   : > { %1778 = vadd.xlane.f32.xlu0 %v1777_v30  ;;  %v1667_v35 = vsel %vm1393_vm3, %v2845_v34, 0.0 }
 0x586   : > { %1563 = vrot.lane.b32.xlu0 %v3390_v37, %s2969_s21  ;;  %s3647_s21 = scalar_lea.vmem %s3590_s12, %s3140_s24 }
 0x591   : > { %1668 = vadd.xlane.f32.xlu1 %v1667_v35 }
 0x5a2   : > { %1673 = vrot.lane.b32.xlu1 %v3390_v37, %s2970_s18 }
 0x5a6   : > { %1783 = vrot.lane.b32.xlu1 %v3390_v37, %s2971_s26  ;;  %s3648_s26 = sld [smem:[#allocation8_spill]] }
 0x5ac   : > { %p2479_p1 = scmp.ne.s32.totalorder %s3648_s26, 1 }
 0x5ad   : > { %vm2161_vm9 = vcmask (!%p2479_p1), 253952   ;;  %s3650_s0 = sld [smem:[#allocation25_spill]] (!%p2479_p1) }
 0x5e9   : > { %v1448_v36 = vpop.xlane.xlu1 %1447 }
 0x5ea   : > { %2846 = vrcp.f32 %v1448_v36  ;;  %v2827_v36 = vld [vmem:[%s3185_s29 + $0x8] sm:$0xff]  }
 0x5ed   : > { %v1453_v38 = vpop.permute.xlu1 %1452  ;;  %v1559_v40 = vpop.xlane.xlu0 %1558 }
 0x5ee   : > { %v1459_v39 = vsel %vm1457_vm5, %v1453_v38, 0  ;;  %2848 = vrcp.f32 %v1559_v40 }
 0x5ef   : > { %2602 = vmatpush3.bf16.msra.mxu0 %v1459_v39 }
 0x5f0   : > { %2613 = vmatprep.subr.bf16.mxu0 %v2958_v20 }
 0x5f4   : > { %v2847_v41 = vpop.eup %2846 }
 0x5f5   : > { %v1450_v42 = vmul.f32 %v2847_v41, %v2839_v22 }
 0x5f7   : > { %v1451_v43 = vpack.c.bf16 %v1450_v42, %v1450_v42  ;;  %v2464_v42 = vld [vmem:[%s3646_s2] ss:$0 sm:$0xff] }
 0x5f8   : > { %v2849_v37 = vpop.eup %2848 }
 0x5f9   : > { %2604 = vmatmul.mubr.msk.bf16.vlgmr.msra.gmra.mrb[8].mxu0 %vm1393_vm3, %v1451_v43  ;;  %v1561_v45 = vmul.f32 %v2849_v37, %v2841_v24  ;;  %v2463_v24 = vld [vmem:[%s3645_s15] ss:$0 sm:$0xff] }
 0x5fa   : > { %2615 = vmatprep.mubr.msk.bf16.mxu0 %vm2959_vm2, %v2958_v20  ;;  %v2465_v37 = vld [vmem:[%s733_s5] ss:$0 sm:$0xff] }
 0x5fb   : > { %v1562_v48 = vpack.c.bf16 %v1561_v45, %v1561_v45 }
 0x5fd   : > { %v1779_v44 = vpop.xlane.xlu0 %1778 }
 0x601   : > { %v1564_v46 = vpop.permute.xlu0 %1563 }
 0x602   : > { %v1569_v47 = vsel %vm1457_vm5, %v1564_v46, 0 }
 0x603   : > { %2614 = vmatpush3.bf16.msra.mxu0 %v1569_v47  ;;  %v2828_v47 = vld [vmem:[%s3199_s23] sm:$0xff]  }
 0x604   : > { %2625 = vmatprep.subr.bf16.mxu0 %v2958_v20 }
 0x606   : > { %2616 = vmatmul.mubr.msk.bf16.vlgmr.msra.gmra.mrb[12].mxu0 %vm1393_vm3, %v1562_v48  ;;  %v2829_v48 = vld [vmem:[%s3199_s23 + $0x8] sm:$0xff]  }
 0x607   : > { %2627 = vmatprep.mubr.msk.bf16.mxu0 %vm2959_vm2, %v2958_v20 }
 0x61e   : > { %v1669_v49 = vpop.xlane.xlu1 %1668 }
 0x61f   : > { %2850 = vrcp.f32 %v1669_v49  ;;  %v2830_v49 = vld [vmem:[%s3199_s23 + $0x10] sm:$0xff]  }
 0x620   : > { %2852 = vrcp.f32 %v1779_v44 }
 0x622   : > { %v1674_v50 = vpop.permute.xlu1 %1673 }
 0x623   : > { %v1679_v51 = vsel %vm1457_vm5, %v1674_v50, 0  ;;  %v2831_v50 = vld [vmem:[%s3199_s23 + $0x18] sm:$0xff]  }
 0x624   : > { %2626 = vmatpush3.bf16.msra.mxu0 %v1679_v51  ;;  %v2832_v51 = vld [vmem:[%s3199_s23 + $0x20] sm:$0xff]  }
 0x625   : > { %2637 = vmatprep.subr.bf16.mxu0 %v2958_v20 }
 0x626   : > { %v1784_v54 = vpop.permute.xlu1 %1783 }
 0x627   : > { %v1789_v57 = vsel %vm1457_vm5, %v1784_v54, 0  ;;  %v2835_v54 = vld [vmem:[%s3199_s23 + $0x38] sm:$0xff]  }
 0x629   : > { %v2851_v52 = vpop.eup %2850 }
 0x62a   : > { %v1671_v53 = vmul.f32 %v2851_v52, %v2845_v34  ;;  %v2853_v56 = vpop.eup %2852  ;;  %v2833_v52 = vld [vmem:[%s3199_s23 + $0x28] sm:$0xff]  }
 0x62b   : > { %v1781_v58 = vmul.f32 %v2853_v56, %v2843_v29 }
 0x62c   : > { %v1672_v55 = vpack.c.bf16 %v1671_v53, %v1671_v53  ;;  %v2834_v53 = vld [vmem:[%s3199_s23 + $0x30] sm:$0xff]  }
 0x62d   : > { %v1782_v59 = vpack.c.bf16 %v1781_v58, %v1781_v58 }
 0x62e   : > { %2628 = vmatmul.mubr.msk.bf16.vlgmr.msra.gmra.mrb[16].mxu0 %vm1393_vm3, %v1672_v55  ;;  %v2466_v55 = vld [vmem:[%s3647_s21] ss:$0 sm:$0xff] }
 0x62f   : > { %2638 = vmatpush3.bf16.msra.mxu0 %v1789_v57  ;;  %2639 = vmatprep.mubr.msk.bf16.mxu0 %vm2959_vm2, %v2958_v20 }
 0x630   : > { %2651 = vmatprep.subr.bf16.mxu0 %v2958_v20 }
 0x636   : > { %2640 = vmatmul.mubr.msk.bf16.vlgmr.msra.gmra.mrb[20].mxu0 %vm1393_vm3, %v1782_v59 }
 0x637   : > { %2655 = vmatprep.mubr.msk.bf16.mxu0 %vm2959_vm2, %v2958_v20 }
 0x6cc   : > { %v1495_v60 = vpop.f32.mrb[8].mxu0 }
 0x6cd   : > { %v2605_v61 = vpop.f32.mrb[9].mxu0 }
 0x6ce   : > { %v1498_v62 = vpop.f32.mrb[10].mxu0 }
 0x6cf   : > { %v2606_v63 = vpop.f32.mrb[11].mxu0 }
 0x6d9   : > { %v1605_v0 = vpop.f32.mrb[12].mxu0 }
 0x6da   : > { %1832 = vrot.lane.b32.xlu0 %v1605_v0, %s2972_s1  ;;  %v2617_v1 = vpop.f32.mrb[13].mxu0  ;;  %s3649_s1 = sld [smem:[#allocation24_spill]] (!%p2479_p1) }
 0x6db   : > { %v1608_v2 = vpop.f32.mrb[14].mxu0 }
 0x6dc   : > { %v2618_v3 = vpop.f32.mrb[15].mxu0 }
 0x701   : > { %v1715_v6 = vpop.f32.mrb[16].mxu0 }
 0x702   : > { %1836 = vrot.lane.b32.xlu1 %v1715_v6, %s2973_s7  ;;  %v2629_v7 = vpop.f32.mrb[17].mxu0 }
 0x703   : > { %v1718_v8 = vpop.f32.mrb[18].mxu0 }
 0x704   : > { %v2630_v9 = vpop.f32.mrb[19].mxu0 }
 0x709   : > { %v1825_v10 = vpop.f32.mrb[20].mxu0 }
 0x70a   : > { %1840 = vrot.lane.b32.xlu0 %v1825_v10, %s2974_s30  ;;  %v2641_v11 = vpop.f32.mrb[21].mxu0 }
 0x70b   : > { %v1828_v13 = vpop.f32.mrb[22].mxu0 }
 0x70c   : > { %v2642_v14 = vpop.f32.mrb[23].mxu0 }
 0x74c   : > { %v1833_v15 = vpop.permute.xlu0 %1832 }
 0x74d   : > { %v1843_v17 = vsel %vm1393_vm3, %v1495_v60, %v1833_v15 }
 0x774   : > { %v1837_v16 = vpop.permute.xlu1 %1836 }
 0x775   : > { %v1845_v18 = vsel %vm1844_vm6, %v1843_v17, %v1837_v16 }
 0x77c   : > { %v1841_v19 = vpop.permute.xlu0 %1840 }
 0x77d   : > { %v1847_v21 = vsel %vm1846_vm7, %v1845_v18, %v1841_v19 }
 0x77e   : > { %v1848_v22 = vpack.c.bf16 %v1847_v21, %v1847_v21 }
 0x780   : > { %2648 = vmatmul.mubr.msk.bf16.vlgmr.msra.gmra.mrb[12].mxu1 %vm1293_vm1, %v1848_v22 }
 0x781   : > { %2675 = vmatprep.mubr.msk.bf16.mxu1 %vm2959_vm2, %v2958_v20  ;;  %2660 = vmatpush3.bf16.msra.mxu1 %v2828_v47 }
 0x782   : > { %2661 = vmatprep.subr.bf16.mxu1 %v2958_v20 }
 0x785   : > { %2662 = vmatpush3.bf16.msra.mxu1 %v2829_v48 }
 0x786   : > { %2663 = vmatprep.subr.bf16.mxu1 %v2958_v20 }
 0x789   : > { %2664 = vmatpush3.bf16.msra.mxu1 %v2830_v49 }
 0x78a   : > { %2665 = vmatprep.subr.bf16.mxu1 %v2958_v20 }
 0x78d   : > { %2666 = vmatpush3.bf16.msra.mxu1 %v2831_v50 }
 0x78e   : > { %2667 = vmatprep.subr.bf16.mxu1 %v2958_v20 }
 0x791   : > { %2668 = vmatpush3.bf16.msra.mxu1 %v2832_v51 }
 0x792   : > { %2669 = vmatprep.subr.bf16.mxu1 %v2958_v20 }
 0x795   : > { %2670 = vmatpush3.bf16.msra.mxu1 %v2833_v52 }
 0x796   : > { %2671 = vmatprep.subr.bf16.mxu1 %v2958_v20 }
 0x799   : > { %2672 = vmatpush3.bf16.msra.mxu1 %v2834_v53 }
 0x79a   : > { %2673 = vmatprep.subr.bf16.mxu1 %v2958_v20 }
 0x79d   : > { %2674 = vmatpush3.bf16.msra.mxu1 %v2835_v54 }
 0x853   : > { %v1902_v23 = vpop.f32.mrb[12].mxu1 }
 0x854   : > { %v1908_v25 = vadd.f32 %v1902_v23, %v3356_v12  ;;  %v2649_v26 = vpop.f32.mrb[13].mxu1  ;;  %v2826_v12 = vld [vmem:[%s3185_s29] sm:$0xff]  }
 0x855   : > { %v1905_v27 = vpop.f32.mrb[14].mxu1  ;;  %2652 = vmatpush3.bf16.msra.mxu0 %v2826_v12 }
 0x856   : > { %v3466_v28 = vadd.f32 %v2463_v24, %v1908_v25  ;;  %v2650_v29 = vpop.f32.mrb[15].mxu1  ;;  %2653 = vmatprep.subr.bf16.mxu0 %v2958_v20  ;;  %v2478_v25 = vld [vmem:[%s749_s17] ss:$0 sm:$0xff] }
 0x858   : > { %v1919_v30 = vsel %vm1293_vm1, %v3466_v28, 0.0 }
 0x859   : > { %1920 = vadd.xlane.f32.xlu1 %v1919_v30  ;;  %2654 = vmatpush3.bf16.msra.mxu0 %v2827_v36 }
 0x8e6   : > { %v1921_v31 = vpop.xlane.xlu1 %1920 }
 0x8e7   : > { %v1922_v32 = vmul.f32 0.03125, %v1921_v31 }
 0x8e9   : > { %v1923_v33 = vsub.f32 %v3466_v28, %v1922_v32 }
 0x8eb   : > { %v1924_v34 = vmul.f32 %v1923_v33, %v1923_v33 }
 0x8ed   : > { %v1925_v35 = vsel %vm1293_vm1, %v1924_v34, 0.0 }
 0x8ee   : > { %1926 = vadd.xlane.f32.xlu0 %v1925_v35 }
 0x97b   : > { %v1927_v38 = vpop.xlane.xlu0 %1926 }
 0x97c   : > { %v1928_v39 = vmul.f32 0.03125, %v1927_v38 }
 0x97e   : > { %v1929_v40 = vadd.f32 1e-06, %v1928_v39 }
 0x980   : > { %2854 = vrsqrt.f32 %v1929_v40 }
 0x98a   : > { %v2855_v41 = vpop.eup %2854 }
 0x98b   : > { %v1931_v43 = vmul.f32 %v2855_v41, %v1923_v33  ;;  %v2159_v41 = vld [vmem:[%s3649_s1] sm:$0x1] (!%p2479_p1) }
 0x98d   : > { %v1938_v44 = vmul.f32 %v2464_v42, %v1931_v43  ;;  %v2160_v43 = vld [vmem:[%s3650_s0] sm:$0x1] (!%p2479_p1) }
 0x98f   : > { %v1945_v45 = vadd.f32 %v2465_v37, %v1938_v44 }
 0x991   : > { %v1946_v46 = vpack.c.bf16 %v1945_v45, %v1945_v45 }
 0x993   : > { %2656 = vmatmul.mubr.msk.bf16.vlgmr.msra.gmra.mrb[24].mxu0 %vm1293_vm1, %v1946_v46 }
 0xa66   : > { %v2007_v56 = vpop.f32.mrb[24].mxu0 }
 0xa67   : > { %v2008_v57 = vadd.f32 %v2466_v55, %v2007_v56  ;;  %v2657_v58 = vpop.f32.mrb[25].mxu0 }
 0xa68   : > { %v2010_v59 = vpop.f32.mrb[26].mxu0 }
 0xa69   : > { %v2014_v60 = vmul.f32 0.70710677, %v2008_v57  ;;  %v2658_v61 = vpop.f32.mrb[27].mxu0  ;;  %v2013_v19 = vmul.f32 0.5, %v2008_v57 }
 0xa6b   : > { %v2015_v62 = vand.u32 2147483647, %v2014_v60  ;;  %vm2035_vm8 = vcmp.ge.f32.partialorder %v2014_v60, 0.0 }
 0xa6d   : > { %v2016_v63 = vmul.f32 0.3275911, %v2015_v62  ;;  %v2029_v1 = vsub.f32 0.0, %v2015_v62 }
 0xa6f   : > { %v2017_v0 = vadd.f32 1.0, %v2016_v63  ;;  %v2030_v20 = vmul.f32 %v2029_v1, %v2015_v62 }
 0xa71   : > { %2856 = vrcp.f32 %v2017_v0  ;;  %v2031_v5 = vmul.f32 1.442695, %v2030_v20 }
 0xa73   : > { %2858 = vpow2.f32 %v2031_v5 }
 0xa7b   : > { %v2857_v2 = vpop.eup %2856 }
 0xa7c   : > { %v2020_v3 = vmul.f32 1.0614054, %v2857_v2 }
 0xa7d   : > { %v2859_v14 = vpop.eup %2858 }
 0xa7e   : > { %v2021_v4 = vadd.f32 -1.4531521, %v2020_v3 }
 0xa80   : > { %v2022_v6 = vmul.f32 %v2857_v2, %v2021_v4 }
 0xa82   : > { %v2023_v7 = vadd.f32 1.4214138, %v2022_v6 }
 0xa84   : > { %v2024_v8 = vmul.f32 %v2857_v2, %v2023_v7 }
 0xa86   : > { %v2025_v9 = vadd.f32 -0.28449672, %v2024_v8 }
 0xa88   : > { %v2026_v10 = vmul.f32 %v2857_v2, %v2025_v9 }
 0xa8a   : > { %v2027_v11 = vadd.f32 0.2548296, %v2026_v10 }
 0xa8c   : > { %v2028_v13 = vmul.f32 %v2857_v2, %v2027_v11 }
 0xa8e   : > { %v2033_v15 = vmul.f32 %v2859_v14, %v2028_v13 }
 0xa90   : > { %v2034_v16 = vsub.f32 1.0, %v2033_v15 }
 0xa92   : > { %v2036_v17 = vsub.f32 0.0, %v2034_v16 }
 0xa94   : > { %v2037_v18 = vsel %vm2035_vm8, %v2034_v16, %v2036_v17 }
 0xa95   : > { %v2038_v21 = vadd.f32 1.0, %v2037_v18 }
 0xa97   : > { %v2039_v22 = vmul.f32 %v2038_v21, %v2013_v19 }
 0xa99   : > { %v2040_v23 = vpack.c.bf16 %v2039_v22, %v2039_v22 }
 0xa9b   : > { %2676 = vmatmul.mubr.bf16.vlgmr.msra.gmra.mrb[16].mxu1 %v2040_v23 }
 0xb6d   : > { %2158 = sbr.rel (%p2479_p1) target bundleno = 3245 (0xcad), region = 96 }
 0xb6e   : > { %v2139_v24 = vpop.f32.mrb[16].mxu1 }
 0xb6f   : > { %v2145_v26 = vadd.f32 %v2139_v24, %v3466_v28  ;;  %v2677_v27 = vpop.f32.mrb[17].mxu1 }
 0xb70   : > { %v2142_v29 = vpop.f32.mrb[18].mxu1 }
 0xb71   : > { %v2153_v30 = vadd.f32 %v2478_v25, %v2145_v26  ;;  %v2678_v31 = vpop.f32.mrb[19].mxu1 }
 0xb73   : > { %2154 = vst.msk [vmem:[#allocation2] sm:$0xff] %vm1293_vm1, %v2153_v30  ;;  %v2162_v32 = vsel (!%p2479_p1), %vm2161_vm9, %v2153_v30, 0.0 }
 0xb74   : > { %2163 = vadd.xlane.f32.xlu0 %v2162_v32 }
 0xc01   : > { %v2164_v33 = vpop.xlane.xlu0 %2163 }
 0xc02   : > { %v2165_v34 = vmul.f32 0.03125, %v2164_v33 }
 0xc04   : > { %v2166_v35 = vsub.f32 %v2153_v30, %v2165_v34 }
 0xc06   : > { %v2167_v12 = vmul.f32 %v2166_v35, %v2166_v35 }
 0xc08   : > { %v2168_v28 = vsel %vm2161_vm9, %v2167_v12, 0.0 }
 0xc09   : > { %2169 = vadd.xlane.f32.xlu0 %v2168_v28 }
 0xc96   : > { %v2170_v36 = vpop.xlane.xlu0 %2169 }
 0xc97   : > { %v2171_v38 = vmul.f32 0.03125, %v2170_v36 }
 0xc99   : > { %v2172_v39 = vadd.f32 1e-06, %v2171_v38 }
 0xc9b   : > { %2860 = vrsqrt.f32 %v2172_v39 }
 0xca5   : > { %v2861_v40 = vpop.eup %2860 }
 0xca6   : > { %v2174_v42 = vmul.f32 %v2861_v40, %v2166_v35 }
 0xca8   : > { %v2175_v37 = vmul.f32 %v2174_v42, %v2159_v41 }
 0xcaa   : > { %v2176_v44 = vadd.f32 %v2175_v37, %v2160_v43 }
 0xcac   : > { %2177 = vst.msk [vmem:[%s3203_s16] sm:$0x1] %vm2161_vm9, %v2176_v44 }
 0xcad PF: > { %s3651_s22 = sld [smem:[#allocation9_spill]]  ;;  %s3653_s20 = sld [smem:[#allocation26_spill]] }
 0xcae   : > { %s2191_s5 = sshll.u32 %s3203_s16, 4  ;;  %s3654_s29 = sand.u32 1, %s2932_s25   ;;  %s2192_s5 = int_to_ptr.vmem [resolvable:$true] %s2191_s5 }
 0xcaf   : > { %s2179_s21 = scalar_lea.sflag [#allocation4], %s3654_s29  ;;  %s2862_s23 = scalar_lea.vmem %s2192_s5, 16 }
 0xcb0   : > { %p2863_p2 = scmp.ne.s32.totalorder %s2192_s5, %s2862_s23  ;;  %s2975_s18 = smov [#allocation3]  }
 0xcb1   : > { %s2866_s26 = sshll.u32 %s2975_s18, 4  ;;  %s2867_s26 = int_to_ptr.vmem [resolvable:$false] %s2866_s26 }
 0xcb2   : > { %p2864_p4 = pnand %p2863_p2, %p3115_p3  ;;  %s2868_s24 = scalar_lea.vmem %s2867_s26, 32 }
 0xcb3   : > { %s2480_s4 = sshll.u32 %s3651_s22, 4  ;;  %p2869_p6 = scmp.lt.s32.totalorder %s2192_s5, %s2867_s26 }
 0xcb4   : > { %s3528_s27 = scalar_lea.hbm %s3653_s20, %s2480_s4  ;;  %p2865_p5 = pneg %p2864_p4 }
 0xcb5   : > { %p2870_p7 = scmp.lt.s32.totalorder %s2868_s24, %s2862_s23 }
 0xcb7   : > { %p2871_p8 = por %p2870_p7, %p2869_p6 }
 0xcb9   : > { %p2872_p10 = pnand %p2871_p8, %p2865_p5 }
 0xcbb   : > { %2875 = shalt.err (!%p2872_p10)
}
 0xcbc   : > { %s2876_s16 = scalar_lea.hbm %s3528_s27, 16  ;;  %s2880_s7 = scalar_lea.hbm %s3653_s20, 32 }
 0xcbd   : > { %p2877_p11 = scmp.ne.s32.totalorder %s3528_s27, %s2876_s16  ;;  %p2881_p0 = scmp.lt.u32.totalorder %s3528_s27, %s3653_s20 }
 0xcbe   : > { %p2882_p1 = scmp.lt.u32.totalorder %s2880_s7, %s2876_s16  ;;  %p2884_p4 = scmp.lt.u32.totalorder %s2876_s16, %s3528_s27 }
 0xcbf   : > { %p2878_p12 = pnand %p2877_p11, %p3115_p3 }
 0xcc0   : > { %p2883_p2 = por %p2882_p1, %p2881_p0 }
 0xcc1   : > { %p2879_p13 = pneg %p2878_p12 }
 0xcc2   : > { %p2885_p5 = por %p2884_p4, %p2883_p2 }
 0xcc4   : > { %p2886_p6 = pnand %p2885_p5, %p2879_p13 }
 0xcc6   : > { %2889 = shalt.err (!%p2886_p6)
}
 0xcc7   : > { %2680 = dma.vmem_to_hbm [thread:$0]  (%p3115_p3), %s2192_s5, 16, %s3528_s27, %s2179_s21  }
 0xcc8 PF: > { %s3655_s22 = sld [smem:[#allocation12_spill]]  ;;  %s3656_s4 = sld [smem:[#allocation6_spill]] }
 0xcce   : > { %p2686_p7 = scmp.ge.s32.totalorder %s3655_s22, 2  ;;  %s2203_s2 = sand.u32 1, %s3656_s4  }
 0xccf   : > { %s2204_s29 = scalar_lea.sflag [#allocation4], %s2203_s2 }
 0xcd0   : > { %p2683_p8 = pnand %p2686_p7, %p3125_p9 }
 0xcd2   : > { %2923 = dma.done.wait (!%p2683_p8), %s2204_s29, 16  }
 0xcd3   : > { %2925 = vsyncadd (!%p2683_p8), %s2204_s29, 4294967280  ;;  %s30_s30 = sadd.s32 1, %s3655_s22   ;;  %s3658_s23 = sld [smem:[#allocation7_spill]] }
 0xcd4   : > { %p27_p10 = scmp.ge.s32.totalorder %s30_s30, 6   ;;  %s3659_s26 = sld [smem:[#allocation17_spill]] }
 0xcd5   : > { %s3660_s27 = sld [smem:[#allocation10_spill]]  ;;  %s3661_s28 = sld [smem:[#allocation11_spill]] }
 0xcd6   : > { %s3662_s29 = sld [smem:[#allocation13_spill]]  ;;  %s3663_s0 = sld [smem:[#allocation15_spill]] }
 0xcd7   : > { %s3664_s24 = smov %s2932_s25  ;;  %29 = sbr.rel (!%p27_p10) target bundleno = 15 (0xf), region = 167 }
 0xcd9   : > { %s3665_s25 = smov %s3658_s23 }
 0xcde   :  { %2208 = vsyncpa [#allocation4], 1 }
 0xcdf   :  { %2210 = vsyncpa [#allocation4 + $0x1], 1 }

</bundles_post_ra>
